<compile_context>
chip_gen: v6e
topology: v6e:2x2x1
jax: 0.10.0
libtpu: 0.0.40
codegen_flags: <defaults>
</compile_context>

<pallas_src>
import math

import jax
import jax.numpy as jnp
import numpy as np
from jax import lax
from jax.experimental import pallas as pl
from jax.experimental.pallas import tpu as pltpu

NLV_BCD = 6  # -> 5 pooling levels


def _level_params(H, W, nlv_bcd):
    levels = []
    for i in range(nlv_bcd - 1):
        k = i + 2
        s = (i + 2) // 2
        out_h = (H - k) // s + 1  # MaxPool2d: no padding, floor mode
        out_w = (W - k) // s + 1
        levels.append((k, s, out_h, out_w))
    return levels


def _sliding_max_w(r, k):
    """Log-depth stride-1 'valid' sliding max of window k along axis 0.

    r: (W, CB) -> (W-k+1, CB), out[i] = max(r[i:i+k])."""
    cur, win = r, 1
    while 2 * win <= k:
        cur = jnp.maximum(cur[:-win], cur[win:])
        win *= 2
    rem = k - win
    if rem > 0:
        cur = jnp.maximum(cur[:-rem], cur[rem:])
    return cur


def _make_kernel(H, W, nlv_bcd, CB, n_chunks, use_pairs):
    levels = _level_params(H, W, nlv_bcd)
    X = [-math.log(i + 2, 2) for i in range(nlv_bcd - 1)]
    meanX = sum(X) / len(X)
    Xc = [float(v - meanX) for v in X]            # sums to 0 -> meanY cancels
    inv_denom = 1.0 / float(sum(c * c for c in Xc))

    def kernel(x_ref, o_ref, *scratch):
        # x_ref: (H, W, LB) VMEM block (LB = n_chunks*CB planes, batch on lanes)
        # o_ref: (1, LB) lane-dense output block
        # scratch[0] (if use_pairs): (H-1, W, CB) pair-max scratch (input dtype)
        p_ref = scratch[0] if use_pairs else None

        for c in range(n_chunks):
            lo = c * CB

            def xrow(h):
                if n_chunks == 1:
                    return x_ref[h]
                return x_ref[h, :, lo:lo + CB]

            if use_pairs:
                # Adjacent-row pair maxima computed once, reused by all levels.
                prev = xrow(0)
                for h in range(H - 1):
                    nxt = xrow(h + 1)
                    p_ref[h] = jnp.maximum(prev, nxt)
                    prev = nxt

            num = None
            for (k, s, out_h, out_w), cX in zip(levels, Xc):
                Wp = W - k + 1
                acc = jnp.zeros((Wp, CB), jnp.float32)
                for oh in range(out_h):
                    h0 = oh * s
                    if use_pairs:
                        # k-row window max from the shared pair maxima.
                        idxs = list(range(h0, h0 + k - 1, 2))
                        if k % 2 == 1:
                            idxs.append(h0 + k - 2)
                        r = p_ref[idxs[0]]
                        for j in idxs[1:]:
                            r = jnp.maximum(r, p_ref[j])
                    else:
                        r = xrow(h0)
                        for dh in range(1, k):
                            r = jnp.maximum(r, xrow(h0 + dh))
                    wmax = _sliding_max_w(r, k)                # (Wp, CB)
                    acc = acc + wmax.astype(jnp.float32)
                if s > 1:
                    # Loop-invariant strided-column selector, applied once.
                    w_pos = lax.broadcasted_iota(jnp.int32, (Wp, CB), 0)
                    acc = jnp.where(w_pos % s == 0, acc, 0.0)
                s_i = jnp.sum(acc, axis=0, keepdims=True)      # (1, CB)
                y = jnp.log2(jnp.maximum(s_i, 0.0) + 1.0)      # log2(ReLU+1)
                t = y * jnp.float32(cX)
                num = t if num is None else num + t            # sum(c_i*y_i)

            res = num * jnp.float32(inv_denom)                 # (1, CB)
            if n_chunks == 1:
                o_ref[...] = res
            else:
                o_ref[:, lo:lo + CB] = res

    return kernel


def gdcb_forward(x, nlv_bcd=NLV_BCD):
    N, C, H, W = x.shape
    NC = N * C
    levels = _level_params(H, W, nlv_bcd)
    for (k, s, out_h, out_w) in levels:
        if out_h < 1 or out_w < 1:
            raise ValueError(
                f"Input spatial dims ({H},{W}) too small for pool kernel {k} "
                "(PyTorch MaxPool2d would also fail).")

    if x.dtype not in (jnp.float32, jnp.bfloat16):
        x = x.astype(jnp.float32)          # keep bf16 native (exact maxima)
    itemsize = x.dtype.itemsize

    # Physical VMEM budget (3/4 cap); fall back to the smallest gen (v7x 64MiB).
    try:
        info = pltpu.get_tpu_info()
        phys_vmem = int(getattr(info, "vmem_capacity_bytes", 0)) or (64 << 20)
    except Exception:
        phys_vmem = 64 << 20
    vmem_cap = (phys_vmem * 3) // 4

    # --- lane tiling -------------------------------------------------------
    nc_units = -(-NC // 128)                       # 128-lane units needed
    # per-chunk lanes capped by vreg pressure (~5*ceil(W/8) vregs / 128 lanes)
    cb_units = max(1, min(4, 48 // (5 * (-(-W // 8)))))
    # lane extent of one VMEM block: amortize per-step overhead, cap ~4 MiB /
    # 2048 lanes
    unit_bytes = H * W * 128 * itemsize
    lb_cap = min(16, max(1, (4 << 20) // unit_bytes))
    if 2 <= nc_units <= lb_cap:
        # split into >= 2 grid steps so v7x can use both TensorCores
        lb_units = -(-nc_units // 2)
    else:
        lb_units = min(lb_cap, nc_units)
    cb_units = min(cb_units, lb_units)
    lb_units = max(cb_units, (lb_units // cb_units) * cb_units)
    CB, LB = 128 * cb_units, 128 * lb_units
    n_chunks = lb_units // cb_units
    NC_pad = LB * (-(-NC // LB))

    # --- VMEM accounting ----------------------------------------------------
    in_block = H * W * LB * itemsize               # double-buffered by Pallas
    pair_bytes = max(H - 1, 1) * W * CB * itemsize
    use_pairs = (2 * in_block + pair_bytes + (2 << 20)) <= vmem_cap
    need = 2 * in_block + (pair_bytes if use_pairs else 0) + (2 << 20)
    if need > vmem_cap:
        # TODO(synk): add an H-band tiling path (k_max-1 row halo, per-level
        # partial sums in VMEM scratch) so very large planes fit v7x's 64 MiB.
        raise ValueError(
            f"spatial plane {H}x{W} too large for whole-plane blocking on this "
            f"TPU (~{need >> 20} MiB VMEM needed, cap {vmem_cap >> 20} MiB)")
    vmem_limit = None
    if need > (12 << 20):
        vmem_limit = int(min(need + (4 << 20), vmem_cap))

    # --- re-layout: batch on lanes (H, W, NC_pad) ---------------------------
    # TODO(synk): accept a channels-last producer layout / fuse this relayout
    # into the kernel DMA to avoid an extra HBM round-trip (matters on v5e).
    x2 = jnp.transpose(x.reshape(NC, H, W), (1, 2, 0))     # (H, W, NC)
    if NC_pad != NC:
        x2 = jnp.pad(x2, ((0, 0), (0, 0), (0, NC_pad - NC)))

    kernel = _make_kernel(H, W, nlv_bcd, CB, n_chunks, use_pairs)
    scratch_shapes = (
        [pltpu.VMEM((max(H - 1, 1), W, CB), x.dtype)] if use_pairs else [])

    out = pl.pallas_call(
        kernel,
        out_shape=jax.ShapeDtypeStruct((1, NC_pad), jnp.float32),
        grid=(NC_pad // LB,),
        in_specs=[pl.BlockSpec((H, W, LB), lambda i: (0, 0, i))],
        out_specs=pl.BlockSpec((1, LB), lambda i: (0, i)),
        scratch_shapes=scratch_shapes,
        compiler_params=pltpu.CompilerParams(
            dimension_semantics=("parallel",),
            vmem_limit_bytes=vmem_limit,
        ),
    )(x2)
    return out[0, :NC].reshape(N, C, 1, 1)


def gdcb_ref(x, nlv_bcd=NLV_BCD):
    """Pure-JAX reference mirroring the PyTorch module."""
    x = x.astype(jnp.float32)
    ys = []
    for i in range(nlv_bcd - 1):
        k = i + 2
        s = (i + 2) // 2
        pooled = lax.reduce_window(
            x, -jnp.inf, lax.max, (1, 1, k, k), (1, 1, s, s), "VALID"
        )
        ys.append(jnp.sum(pooled, axis=(2, 3), keepdims=True))
    out = jnp.concatenate(ys, axis=2)                              # (N, C, L, 1)
    out = jnp.log2(jnp.maximum(out, 0.0) + 1.0)
    X = jnp.array(
        [-math.log(i + 2, 2) for i in range(nlv_bcd - 1)], dtype=jnp.float32
    ).reshape(1, 1, -1, 1)
    meanX = jnp.mean(X, axis=2, keepdims=True)
    meanY = jnp.mean(out, axis=2, keepdims=True)
    return jnp.sum((out - meanY) * (X - meanX), axis=2, keepdims=True) / jnp.sum(
        (X - meanX) ** 2, axis=2, keepdims=True
    )


if __name__ == "__main__":
    key = jax.random.PRNGKey(0)
    x = jax.random.normal(key, (2, 4, 16, 16), dtype=jnp.float32)

    out = gdcb_forward(x)
    out = jax.block_until_ready(out)
    assert out.shape == (2, 4, 1, 1)

    ref = gdcb_ref(x)
    np.testing.assert_allclose(np.asarray(out), np.asarray(ref), rtol=1e-4, atol=1e-4)

    print("KERNEL_OK")
</pallas_src>

<mosaic_0001>
module attributes {stable_mosaic.version = 11 : i64} {
  func.func @kernel(%arg0: i32, %arg1: memref<16x16x128xf32, #tpu.memory_space<vmem>>, %arg2: memref<1x128xf32, #tpu.memory_space<vmem>>, %arg3: memref<15x16x128xf32, #tpu.memory_space<vmem>>) attributes {dimension_semantics = [#tpu.dimension_semantics<parallel>], iteration_bounds = array<i64: 1>, scalar_prefetch = 0 : i64, scratch_operands = 1 : i64, tpu.core_type = #tpu.core_type<tc>, window_params = [{transform_indices = @transform_0, window_bounds = array<i64: 16, 16, 128>}, {transform_indices = @transform_1, window_bounds = array<i64: 1, 128>}]} {
    %c0 = arith.constant 0 : index
    %c0_0 = arith.constant 0 : index
    %c0_1 = arith.constant 0 : index
    %0 = vector.load %arg1[%c0, %c0_0, %c0_1] : memref<16x16x128xf32, #tpu.memory_space<vmem>>, vector<1x16x128xf32>
    %1 = vector.shape_cast %0 : vector<1x16x128xf32> to vector<16x128xf32>
    %c1 = arith.constant 1 : index
    %c0_2 = arith.constant 0 : index
    %c0_3 = arith.constant 0 : index
    %2 = vector.load %arg1[%c1, %c0_2, %c0_3] : memref<16x16x128xf32, #tpu.memory_space<vmem>>, vector<1x16x128xf32>
    %3 = vector.shape_cast %2 : vector<1x16x128xf32> to vector<16x128xf32>
    %4 = arith.maximumf %1, %3 : vector<16x128xf32>
    %c0_4 = arith.constant 0 : index
    %c0_5 = arith.constant 0 : index
    %c0_6 = arith.constant 0 : index
    %5 = vector.load %arg3[%c0_4, %c0_5, %c0_6] : memref<15x16x128xf32, #tpu.memory_space<vmem>>, vector<1x16x128xf32>
    %6 = vector.shape_cast %5 : vector<1x16x128xf32> to vector<16x128xf32>
    %7 = vector.shape_cast %4 : vector<16x128xf32> to vector<1x16x128xf32>
    tpu.vector_store %arg3[%c0_4, %c0_5, %c0_6], %7 {strides = array<i32>} : memref<15x16x128xf32, #tpu.memory_space<vmem>>, vector<1x16x128xf32>,
    %c2 = arith.constant 2 : index
    %c0_7 = arith.constant 0 : index
    %c0_8 = arith.constant 0 : index
    %8 = vector.load %arg1[%c2, %c0_7, %c0_8] : memref<16x16x128xf32, #tpu.memory_space<vmem>>, vector<1x16x128xf32>
    %9 = vector.shape_cast %8 : vector<1x16x128xf32> to vector<16x128xf32>
    %10 = arith.maximumf %3, %9 : vector<16x128xf32>
    %c1_9 = arith.constant 1 : index
    %c0_10 = arith.constant 0 : index
    %c0_11 = arith.constant 0 : index
    %11 = vector.load %arg3[%c1_9, %c0_10, %c0_11] : memref<15x16x128xf32, #tpu.memory_space<vmem>>, vector<1x16x128xf32>
    %12 = vector.shape_cast %11 : vector<1x16x128xf32> to vector<16x128xf32>
    %13 = vector.shape_cast %10 : vector<16x128xf32> to vector<1x16x128xf32>
    tpu.vector_store %arg3[%c1_9, %c0_10, %c0_11], %13 {strides = array<i32>} : memref<15x16x128xf32, #tpu.memory_space<vmem>>, vector<1x16x128xf32>,
    %c3 = arith.constant 3 : index
    %c0_12 = arith.constant 0 : index
    %c0_13 = arith.constant 0 : index
    %14 = vector.load %arg1[%c3, %c0_12, %c0_13] : memref<16x16x128xf32, #tpu.memory_space<vmem>>, vector<1x16x128xf32>
    %15 = vector.shape_cast %14 : vector<1x16x128xf32> to vector<16x128xf32>
    %16 = arith.maximumf %9, %15 : vector<16x128xf32>
    %c2_14 = arith.constant 2 : index
    %c0_15 = arith.constant 0 : index
    %c0_16 = arith.constant 0 : index
    %17 = vector.load %arg3[%c2_14, %c0_15, %c0_16] : memref<15x16x128xf32, #tpu.memory_space<vmem>>, vector<1x16x128xf32>
    %18 = vector.shape_cast %17 : vector<1x16x128xf32> to vector<16x128xf32>
    %19 = vector.shape_cast %16 : vector<16x128xf32> to vector<1x16x128xf32>
    tpu.vector_store %arg3[%c2_14, %c0_15, %c0_16], %19 {strides = array<i32>} : memref<15x16x128xf32, #tpu.memory_space<vmem>>, vector<1x16x128xf32>,
    %c4 = arith.constant 4 : index
    %c0_17 = arith.constant 0 : index
    %c0_18 = arith.constant 0 : index
    %20 = vector.load %arg1[%c4, %c0_17, %c0_18] : memref<16x16x128xf32, #tpu.memory_space<vmem>>, vector<1x16x128xf32>
    %21 = vector.shape_cast %20 : vector<1x16x128xf32> to vector<16x128xf32>
    %22 = arith.maximumf %15, %21 : vector<16x128xf32>
    %c3_19 = arith.constant 3 : index
    %c0_20 = arith.constant 0 : index
    %c0_21 = arith.constant 0 : index
    %23 = vector.load %arg3[%c3_19, %c0_20, %c0_21] : memref<15x16x128xf32, #tpu.memory_space<vmem>>, vector<1x16x128xf32>
    %24 = vector.shape_cast %23 : vector<1x16x128xf32> to vector<16x128xf32>
    %25 = vector.shape_cast %22 : vector<16x128xf32> to vector<1x16x128xf32>
    tpu.vector_store %arg3[%c3_19, %c0_20, %c0_21], %25 {strides = array<i32>} : memref<15x16x128xf32, #tpu.memory_space<vmem>>, vector<1x16x128xf32>,
    %c5 = arith.constant 5 : index
    %c0_22 = arith.constant 0 : index
    %c0_23 = arith.constant 0 : index
    %26 = vector.load %arg1[%c5, %c0_22, %c0_23] : memref<16x16x128xf32, #tpu.memory_space<vmem>>, vector<1x16x128xf32>
    %27 = vector.shape_cast %26 : vector<1x16x128xf32> to vector<16x128xf32>
    %28 = arith.maximumf %21, %27 : vector<16x128xf32>
    %c4_24 = arith.constant 4 : index
    %c0_25 = arith.constant 0 : index
    %c0_26 = arith.constant 0 : index
    %29 = vector.load %arg3[%c4_24, %c0_25, %c0_26] : memref<15x16x128xf32, #tpu.memory_space<vmem>>, vector<1x16x128xf32>
    %30 = vector.shape_cast %29 : vector<1x16x128xf32> to vector<16x128xf32>
    %31 = vector.shape_cast %28 : vector<16x128xf32> to vector<1x16x128xf32>
    tpu.vector_store %arg3[%c4_24, %c0_25, %c0_26], %31 {strides = array<i32>} : memref<15x16x128xf32, #tpu.memory_space<vmem>>, vector<1x16x128xf32>,
    %c6 = arith.constant 6 : index
    %c0_27 = arith.constant 0 : index
    %c0_28 = arith.constant 0 : index
    %32 = vector.load %arg1[%c6, %c0_27, %c0_28] : memref<16x16x128xf32, #tpu.memory_space<vmem>>, vector<1x16x128xf32>
    %33 = vector.shape_cast %32 : vector<1x16x128xf32> to vector<16x128xf32>
    %34 = arith.maximumf %27, %33 : vector<16x128xf32>
    %c5_29 = arith.constant 5 : index
    %c0_30 = arith.constant 0 : index
    %c0_31 = arith.constant 0 : index
    %35 = vector.load %arg3[%c5_29, %c0_30, %c0_31] : memref<15x16x128xf32, #tpu.memory_space<vmem>>, vector<1x16x128xf32>
    %36 = vector.shape_cast %35 : vector<1x16x128xf32> to vector<16x128xf32>
    %37 = vector.shape_cast %34 : vector<16x128xf32> to vector<1x16x128xf32>
    tpu.vector_store %arg3[%c5_29, %c0_30, %c0_31], %37 {strides = array<i32>} : memref<15x16x128xf32, #tpu.memory_space<vmem>>, vector<1x16x128xf32>,
    %c7 = arith.constant 7 : index
    %c0_32 = arith.constant 0 : index
    %c0_33 = arith.constant 0 : index
    %38 = vector.load %arg1[%c7, %c0_32, %c0_33] : memref<16x16x128xf32, #tpu.memory_space<vmem>>, vector<1x16x128xf32>
    %39 = vector.shape_cast %38 : vector<1x16x128xf32> to vector<16x128xf32>
    %40 = arith.maximumf %33, %39 : vector<16x128xf32>
    %c6_34 = arith.constant 6 : index
    %c0_35 = arith.constant 0 : index
    %c0_36 = arith.constant 0 : index
    %41 = vector.load %arg3[%c6_34, %c0_35, %c0_36] : memref<15x16x128xf32, #tpu.memory_space<vmem>>, vector<1x16x128xf32>
    %42 = vector.shape_cast %41 : vector<1x16x128xf32> to vector<16x128xf32>
    %43 = vector.shape_cast %40 : vector<16x128xf32> to vector<1x16x128xf32>
    tpu.vector_store %arg3[%c6_34, %c0_35, %c0_36], %43 {strides = array<i32>} : memref<15x16x128xf32, #tpu.memory_space<vmem>>, vector<1x16x128xf32>,
    %c8 = arith.constant 8 : index
    %c0_37 = arith.constant 0 : index
    %c0_38 = arith.constant 0 : index
    %44 = vector.load %arg1[%c8, %c0_37, %c0_38] : memref<16x16x128xf32, #tpu.memory_space<vmem>>, vector<1x16x128xf32>
    %45 = vector.shape_cast %44 : vector<1x16x128xf32> to vector<16x128xf32>
    %46 = arith.maximumf %39, %45 : vector<16x128xf32>
    %c7_39 = arith.constant 7 : index
    %c0_40 = arith.constant 0 : index
    %c0_41 = arith.constant 0 : index
    %47 = vector.load %arg3[%c7_39, %c0_40, %c0_41] : memref<15x16x128xf32, #tpu.memory_space<vmem>>, vector<1x16x128xf32>
    %48 = vector.shape_cast %47 : vector<1x16x128xf32> to vector<16x128xf32>
    %49 = vector.shape_cast %46 : vector<16x128xf32> to vector<1x16x128xf32>
    tpu.vector_store %arg3[%c7_39, %c0_40, %c0_41], %49 {strides = array<i32>} : memref<15x16x128xf32, #tpu.memory_space<vmem>>, vector<1x16x128xf32>,
    %c9 = arith.constant 9 : index
    %c0_42 = arith.constant 0 : index
    %c0_43 = arith.constant 0 : index
    %50 = vector.load %arg1[%c9, %c0_42, %c0_43] : memref<16x16x128xf32, #tpu.memory_space<vmem>>, vector<1x16x128xf32>
    %51 = vector.shape_cast %50 : vector<1x16x128xf32> to vector<16x128xf32>
    %52 = arith.maximumf %45, %51 : vector<16x128xf32>
    %c8_44 = arith.constant 8 : index
    %c0_45 = arith.constant 0 : index
    %c0_46 = arith.constant 0 : index
    %53 = vector.load %arg3[%c8_44, %c0_45, %c0_46] : memref<15x16x128xf32, #tpu.memory_space<vmem>>, vector<1x16x128xf32>
    %54 = vector.shape_cast %53 : vector<1x16x128xf32> to vector<16x128xf32>
    %55 = vector.shape_cast %52 : vector<16x128xf32> to vector<1x16x128xf32>
    tpu.vector_store %arg3[%c8_44, %c0_45, %c0_46], %55 {strides = array<i32>} : memref<15x16x128xf32, #tpu.memory_space<vmem>>, vector<1x16x128xf32>,
    %c10 = arith.constant 10 : index
    %c0_47 = arith.constant 0 : index
    %c0_48 = arith.constant 0 : index
    %56 = vector.load %arg1[%c10, %c0_47, %c0_48] : memref<16x16x128xf32, #tpu.memory_space<vmem>>, vector<1x16x128xf32>
    %57 = vector.shape_cast %56 : vector<1x16x128xf32> to vector<16x128xf32>
    %58 = arith.maximumf %51, %57 : vector<16x128xf32>
    %c9_49 = arith.constant 9 : index
    %c0_50 = arith.constant 0 : index
    %c0_51 = arith.constant 0 : index
    %59 = vector.load %arg3[%c9_49, %c0_50, %c0_51] : memref<15x16x128xf32, #tpu.memory_space<vmem>>, vector<1x16x128xf32>
    %60 = vector.shape_cast %59 : vector<1x16x128xf32> to vector<16x128xf32>
    %61 = vector.shape_cast %58 : vector<16x128xf32> to vector<1x16x128xf32>
    tpu.vector_store %arg3[%c9_49, %c0_50, %c0_51], %61 {strides = array<i32>} : memref<15x16x128xf32, #tpu.memory_space<vmem>>, vector<1x16x128xf32>,
    %c11 = arith.constant 11 : index
    %c0_52 = arith.constant 0 : index
    %c0_53 = arith.constant 0 : index
    %62 = vector.load %arg1[%c11, %c0_52, %c0_53] : memref<16x16x128xf32, #tpu.memory_space<vmem>>, vector<1x16x128xf32>
    %63 = vector.shape_cast %62 : vector<1x16x128xf32> to vector<16x128xf32>
    %64 = arith.maximumf %57, %63 : vector<16x128xf32>
    %c10_54 = arith.constant 10 : index
    %c0_55 = arith.constant 0 : index
    %c0_56 = arith.constant 0 : index
    %65 = vector.load %arg3[%c10_54, %c0_55, %c0_56] : memref<15x16x128xf32, #tpu.memory_space<vmem>>, vector<1x16x128xf32>
    %66 = vector.shape_cast %65 : vector<1x16x128xf32> to vector<16x128xf32>
    %67 = vector.shape_cast %64 : vector<16x128xf32> to vector<1x16x128xf32>
    tpu.vector_store %arg3[%c10_54, %c0_55, %c0_56], %67 {strides = array<i32>} : memref<15x16x128xf32, #tpu.memory_space<vmem>>, vector<1x16x128xf32>,
    %c12 = arith.constant 12 : index
    %c0_57 = arith.constant 0 : index
    %c0_58 = arith.constant 0 : index
    %68 = vector.load %arg1[%c12, %c0_57, %c0_58] : memref<16x16x128xf32, #tpu.memory_space<vmem>>, vector<1x16x128xf32>
    %69 = vector.shape_cast %68 : vector<1x16x128xf32> to vector<16x128xf32>
    %70 = arith.maximumf %63, %69 : vector<16x128xf32>
    %c11_59 = arith.constant 11 : index
    %c0_60 = arith.constant 0 : index
    %c0_61 = arith.constant 0 : index
    %71 = vector.load %arg3[%c11_59, %c0_60, %c0_61] : memref<15x16x128xf32, #tpu.memory_space<vmem>>, vector<1x16x128xf32>
    %72 = vector.shape_cast %71 : vector<1x16x128xf32> to vector<16x128xf32>
    %73 = vector.shape_cast %70 : vector<16x128xf32> to vector<1x16x128xf32>
    tpu.vector_store %arg3[%c11_59, %c0_60, %c0_61], %73 {strides = array<i32>} : memref<15x16x128xf32, #tpu.memory_space<vmem>>, vector<1x16x128xf32>,
    %c13 = arith.constant 13 : index
    %c0_62 = arith.constant 0 : index
    %c0_63 = arith.constant 0 : index
    %74 = vector.load %arg1[%c13, %c0_62, %c0_63] : memref<16x16x128xf32, #tpu.memory_space<vmem>>, vector<1x16x128xf32>
    %75 = vector.shape_cast %74 : vector<1x16x128xf32> to vector<16x128xf32>
    %76 = arith.maximumf %69, %75 : vector<16x128xf32>
    %c12_64 = arith.constant 12 : index
    %c0_65 = arith.constant 0 : index
    %c0_66 = arith.constant 0 : index
    %77 = vector.load %arg3[%c12_64, %c0_65, %c0_66] : memref<15x16x128xf32, #tpu.memory_space<vmem>>, vector<1x16x128xf32>
    %78 = vector.shape_cast %77 : vector<1x16x128xf32> to vector<16x128xf32>
    %79 = vector.shape_cast %76 : vector<16x128xf32> to vector<1x16x128xf32>
    tpu.vector_store %arg3[%c12_64, %c0_65, %c0_66], %79 {strides = array<i32>} : memref<15x16x128xf32, #tpu.memory_space<vmem>>, vector<1x16x128xf32>,
    %c14 = arith.constant 14 : index
    %c0_67 = arith.constant 0 : index
    %c0_68 = arith.constant 0 : index
    %80 = vector.load %arg1[%c14, %c0_67, %c0_68] : memref<16x16x128xf32, #tpu.memory_space<vmem>>, vector<1x16x128xf32>
    %81 = vector.shape_cast %80 : vector<1x16x128xf32> to vector<16x128xf32>
    %82 = arith.maximumf %75, %81 : vector<16x128xf32>
    %c13_69 = arith.constant 13 : index
    %c0_70 = arith.constant 0 : index
    %c0_71 = arith.constant 0 : index
    %83 = vector.load %arg3[%c13_69, %c0_70, %c0_71] : memref<15x16x128xf32, #tpu.memory_space<vmem>>, vector<1x16x128xf32>
    %84 = vector.shape_cast %83 : vector<1x16x128xf32> to vector<16x128xf32>
    %85 = vector.shape_cast %82 : vector<16x128xf32> to vector<1x16x128xf32>
    tpu.vector_store %arg3[%c13_69, %c0_70, %c0_71], %85 {strides = array<i32>} : memref<15x16x128xf32, #tpu.memory_space<vmem>>, vector<1x16x128xf32>,
    %c15 = arith.constant 15 : index
    %c0_72 = arith.constant 0 : index
    %c0_73 = arith.constant 0 : index
    %86 = vector.load %arg1[%c15, %c0_72, %c0_73] : memref<16x16x128xf32, #tpu.memory_space<vmem>>, vector<1x16x128xf32>
    %87 = vector.shape_cast %86 : vector<1x16x128xf32> to vector<16x128xf32>
    %88 = arith.maximumf %81, %87 : vector<16x128xf32>
    %c14_74 = arith.constant 14 : index
    %c0_75 = arith.constant 0 : index
    %c0_76 = arith.constant 0 : index
    %89 = vector.load %arg3[%c14_74, %c0_75, %c0_76] : memref<15x16x128xf32, #tpu.memory_space<vmem>>, vector<1x16x128xf32>
    %90 = vector.shape_cast %89 : vector<1x16x128xf32> to vector<16x128xf32>
    %91 = vector.shape_cast %88 : vector<16x128xf32> to vector<1x16x128xf32>
    tpu.vector_store %arg3[%c14_74, %c0_75, %c0_76], %91 {strides = array<i32>} : memref<15x16x128xf32, #tpu.memory_space<vmem>>, vector<1x16x128xf32>,
    %cst = arith.constant 0.000000e+00 : f32
    %92 = vector.broadcast %cst : f32 to vector<15x128xf32>
    %c0_77 = arith.constant 0 : index
    %c0_78 = arith.constant 0 : index
    %c0_79 = arith.constant 0 : index
    %93 = vector.load %arg3[%c0_77, %c0_78, %c0_79] : memref<15x16x128xf32, #tpu.memory_space<vmem>>, vector<1x16x128xf32>
    %94 = vector.shape_cast %93 : vector<1x16x128xf32> to vector<16x128xf32>
    %95 = vector.extract_strided_slice %94 {offsets = [0, 0], sizes = [15, 128], strides = [1, 1]} : vector<16x128xf32> to vector<15x128xf32>
    %96 = vector.extract_strided_slice %94 {offsets = [1, 0], sizes = [15, 128], strides = [1, 1]} : vector<16x128xf32> to vector<15x128xf32>
    %97 = arith.maximumf %95, %96 : vector<15x128xf32>
    %98 = arith.addf %92, %97 : vector<15x128xf32>
    %c1_80 = arith.constant 1 : index
    %c0_81 = arith.constant 0 : index
    %c0_82 = arith.constant 0 : index
    %99 = vector.load %arg3[%c1_80, %c0_81, %c0_82] : memref<15x16x128xf32, #tpu.memory_space<vmem>>, vector<1x16x128xf32>
    %100 = vector.shape_cast %99 : vector<1x16x128xf32> to vector<16x128xf32>
    %101 = vector.extract_strided_slice %100 {offsets = [0, 0], sizes = [15, 128], strides = [1, 1]} : vector<16x128xf32> to vector<15x128xf32>
    %102 = vector.extract_strided_slice %100 {offsets = [1, 0], sizes = [15, 128], strides = [1, 1]} : vector<16x128xf32> to vector<15x128xf32>
    %103 = arith.maximumf %101, %102 : vector<15x128xf32>
    %104 = arith.addf %98, %103 : vector<15x128xf32>
    %c2_83 = arith.constant 2 : index
    %c0_84 = arith.constant 0 : index
    %c0_85 = arith.constant 0 : index
    %105 = vector.load %arg3[%c2_83, %c0_84, %c0_85] : memref<15x16x128xf32, #tpu.memory_space<vmem>>, vector<1x16x128xf32>
    %106 = vector.shape_cast %105 : vector<1x16x128xf32> to vector<16x128xf32>
    %107 = vector.extract_strided_slice %106 {offsets = [0, 0], sizes = [15, 128], strides = [1, 1]} : vector<16x128xf32> to vector<15x128xf32>
    %108 = vector.extract_strided_slice %106 {offsets = [1, 0], sizes = [15, 128], strides = [1, 1]} : vector<16x128xf32> to vector<15x128xf32>
    %109 = arith.maximumf %107, %108 : vector<15x128xf32>
    %110 = arith.addf %104, %109 : vector<15x128xf32>
    %c3_86 = arith.constant 3 : index
    %c0_87 = arith.constant 0 : index
    %c0_88 = arith.constant 0 : index
    %111 = vector.load %arg3[%c3_86, %c0_87, %c0_88] : memref<15x16x128xf32, #tpu.memory_space<vmem>>, vector<1x16x128xf32>
    %112 = vector.shape_cast %111 : vector<1x16x128xf32> to vector<16x128xf32>
    %113 = vector.extract_strided_slice %112 {offsets = [0, 0], sizes = [15, 128], strides = [1, 1]} : vector<16x128xf32> to vector<15x128xf32>
    %114 = vector.extract_strided_slice %112 {offsets = [1, 0], sizes = [15, 128], strides = [1, 1]} : vector<16x128xf32> to vector<15x128xf32>
    %115 = arith.maximumf %113, %114 : vector<15x128xf32>
    %116 = arith.addf %110, %115 : vector<15x128xf32>
    %c4_89 = arith.constant 4 : index
    %c0_90 = arith.constant 0 : index
    %c0_91 = arith.constant 0 : index
    %117 = vector.load %arg3[%c4_89, %c0_90, %c0_91] : memref<15x16x128xf32, #tpu.memory_space<vmem>>, vector<1x16x128xf32>
    %118 = vector.shape_cast %117 : vector<1x16x128xf32> to vector<16x128xf32>
    %119 = vector.extract_strided_slice %118 {offsets = [0, 0], sizes = [15, 128], strides = [1, 1]} : vector<16x128xf32> to vector<15x128xf32>
    %120 = vector.extract_strided_slice %118 {offsets = [1, 0], sizes = [15, 128], strides = [1, 1]} : vector<16x128xf32> to vector<15x128xf32>
    %121 = arith.maximumf %119, %120 : vector<15x128xf32>
    %122 = arith.addf %116, %121 : vector<15x128xf32>
    %c5_92 = arith.constant 5 : index
    %c0_93 = arith.constant 0 : index
    %c0_94 = arith.constant 0 : index
    %123 = vector.load %arg3[%c5_92, %c0_93, %c0_94] : memref<15x16x128xf32, #tpu.memory_space<vmem>>, vector<1x16x128xf32>
    %124 = vector.shape_cast %123 : vector<1x16x128xf32> to vector<16x128xf32>
    %125 = vector.extract_strided_slice %124 {offsets = [0, 0], sizes = [15, 128], strides = [1, 1]} : vector<16x128xf32> to vector<15x128xf32>
    %126 = vector.extract_strided_slice %124 {offsets = [1, 0], sizes = [15, 128], strides = [1, 1]} : vector<16x128xf32> to vector<15x128xf32>
    %127 = arith.maximumf %125, %126 : vector<15x128xf32>
    %128 = arith.addf %122, %127 : vector<15x128xf32>
    %c6_95 = arith.constant 6 : index
    %c0_96 = arith.constant 0 : index
    %c0_97 = arith.constant 0 : index
    %129 = vector.load %arg3[%c6_95, %c0_96, %c0_97] : memref<15x16x128xf32, #tpu.memory_space<vmem>>, vector<1x16x128xf32>
    %130 = vector.shape_cast %129 : vector<1x16x128xf32> to vector<16x128xf32>
    %131 = vector.extract_strided_slice %130 {offsets = [0, 0], sizes = [15, 128], strides = [1, 1]} : vector<16x128xf32> to vector<15x128xf32>
    %132 = vector.extract_strided_slice %130 {offsets = [1, 0], sizes = [15, 128], strides = [1, 1]} : vector<16x128xf32> to vector<15x128xf32>
    %133 = arith.maximumf %131, %132 : vector<15x128xf32>
    %134 = arith.addf %128, %133 : vector<15x128xf32>
    %c7_98 = arith.constant 7 : index
    %c0_99 = arith.constant 0 : index
    %c0_100 = arith.constant 0 : index
    %135 = vector.load %arg3[%c7_98, %c0_99, %c0_100] : memref<15x16x128xf32, #tpu.memory_space<vmem>>, vector<1x16x128xf32>
    %136 = vector.shape_cast %135 : vector<1x16x128xf32> to vector<16x128xf32>
    %137 = vector.extract_strided_slice %136 {offsets = [0, 0], sizes = [15, 128], strides = [1, 1]} : vector<16x128xf32> to vector<15x128xf32>
    %138 = vector.extract_strided_slice %136 {offsets = [1, 0], sizes = [15, 128], strides = [1, 1]} : vector<16x128xf32> to vector<15x128xf32>
    %139 = arith.maximumf %137, %138 : vector<15x128xf32>
    %140 = arith.addf %134, %139 : vector<15x128xf32>
    %c8_101 = arith.constant 8 : index
    %c0_102 = arith.constant 0 : index
    %c0_103 = arith.constant 0 : index
    %141 = vector.load %arg3[%c8_101, %c0_102, %c0_103] : memref<15x16x128xf32, #tpu.memory_space<vmem>>, vector<1x16x128xf32>
    %142 = vector.shape_cast %141 : vector<1x16x128xf32> to vector<16x128xf32>
    %143 = vector.extract_strided_slice %142 {offsets = [0, 0], sizes = [15, 128], strides = [1, 1]} : vector<16x128xf32> to vector<15x128xf32>
    %144 = vector.extract_strided_slice %142 {offsets = [1, 0], sizes = [15, 128], strides = [1, 1]} : vector<16x128xf32> to vector<15x128xf32>
    %145 = arith.maximumf %143, %144 : vector<15x128xf32>
    %146 = arith.addf %140, %145 : vector<15x128xf32>
    %c9_104 = arith.constant 9 : index
    %c0_105 = arith.constant 0 : index
    %c0_106 = arith.constant 0 : index
    %147 = vector.load %arg3[%c9_104, %c0_105, %c0_106] : memref<15x16x128xf32, #tpu.memory_space<vmem>>, vector<1x16x128xf32>
    %148 = vector.shape_cast %147 : vector<1x16x128xf32> to vector<16x128xf32>
    %149 = vector.extract_strided_slice %148 {offsets = [0, 0], sizes = [15, 128], strides = [1, 1]} : vector<16x128xf32> to vector<15x128xf32>
    %150 = vector.extract_strided_slice %148 {offsets = [1, 0], sizes = [15, 128], strides = [1, 1]} : vector<16x128xf32> to vector<15x128xf32>
    %151 = arith.maximumf %149, %150 : vector<15x128xf32>
    %152 = arith.addf %146, %151 : vector<15x128xf32>
    %c10_107 = arith.constant 10 : index
    %c0_108 = arith.constant 0 : index
    %c0_109 = arith.constant 0 : index
    %153 = vector.load %arg3[%c10_107, %c0_108, %c0_109] : memref<15x16x128xf32, #tpu.memory_space<vmem>>, vector<1x16x128xf32>
    %154 = vector.shape_cast %153 : vector<1x16x128xf32> to vector<16x128xf32>
    %155 = vector.extract_strided_slice %154 {offsets = [0, 0], sizes = [15, 128], strides = [1, 1]} : vector<16x128xf32> to vector<15x128xf32>
    %156 = vector.extract_strided_slice %154 {offsets = [1, 0], sizes = [15, 128], strides = [1, 1]} : vector<16x128xf32> to vector<15x128xf32>
    %157 = arith.maximumf %155, %156 : vector<15x128xf32>
    %158 = arith.addf %152, %157 : vector<15x128xf32>
    %c11_110 = arith.constant 11 : index
    %c0_111 = arith.constant 0 : index
    %c0_112 = arith.constant 0 : index
    %159 = vector.load %arg3[%c11_110, %c0_111, %c0_112] : memref<15x16x128xf32, #tpu.memory_space<vmem>>, vector<1x16x128xf32>
    %160 = vector.shape_cast %159 : vector<1x16x128xf32> to vector<16x128xf32>
    %161 = vector.extract_strided_slice %160 {offsets = [0, 0], sizes = [15, 128], strides = [1, 1]} : vector<16x128xf32> to vector<15x128xf32>
    %162 = vector.extract_strided_slice %160 {offsets = [1, 0], sizes = [15, 128], strides = [1, 1]} : vector<16x128xf32> to vector<15x128xf32>
    %163 = arith.maximumf %161, %162 : vector<15x128xf32>
    %164 = arith.addf %158, %163 : vector<15x128xf32>
    %c12_113 = arith.constant 12 : index
    %c0_114 = arith.constant 0 : index
    %c0_115 = arith.constant 0 : index
    %165 = vector.load %arg3[%c12_113, %c0_114, %c0_115] : memref<15x16x128xf32, #tpu.memory_space<vmem>>, vector<1x16x128xf32>
    %166 = vector.shape_cast %165 : vector<1x16x128xf32> to vector<16x128xf32>
    %167 = vector.extract_strided_slice %166 {offsets = [0, 0], sizes = [15, 128], strides = [1, 1]} : vector<16x128xf32> to vector<15x128xf32>
    %168 = vector.extract_strided_slice %166 {offsets = [1, 0], sizes = [15, 128], strides = [1, 1]} : vector<16x128xf32> to vector<15x128xf32>
    %169 = arith.maximumf %167, %168 : vector<15x128xf32>
    %170 = arith.addf %164, %169 : vector<15x128xf32>
    %c13_116 = arith.constant 13 : index
    %c0_117 = arith.constant 0 : index
    %c0_118 = arith.constant 0 : index
    %171 = vector.load %arg3[%c13_116, %c0_117, %c0_118] : memref<15x16x128xf32, #tpu.memory_space<vmem>>, vector<1x16x128xf32>
    %172 = vector.shape_cast %171 : vector<1x16x128xf32> to vector<16x128xf32>
    %173 = vector.extract_strided_slice %172 {offsets = [0, 0], sizes = [15, 128], strides = [1, 1]} : vector<16x128xf32> to vector<15x128xf32>
    %174 = vector.extract_strided_slice %172 {offsets = [1, 0], sizes = [15, 128], strides = [1, 1]} : vector<16x128xf32> to vector<15x128xf32>
    %175 = arith.maximumf %173, %174 : vector<15x128xf32>
    %176 = arith.addf %170, %175 : vector<15x128xf32>
    %c14_119 = arith.constant 14 : index
    %c0_120 = arith.constant 0 : index
    %c0_121 = arith.constant 0 : index
    %177 = vector.load %arg3[%c14_119, %c0_120, %c0_121] : memref<15x16x128xf32, #tpu.memory_space<vmem>>, vector<1x16x128xf32>
    %178 = vector.shape_cast %177 : vector<1x16x128xf32> to vector<16x128xf32>
    %179 = vector.extract_strided_slice %178 {offsets = [0, 0], sizes = [15, 128], strides = [1, 1]} : vector<16x128xf32> to vector<15x128xf32>
    %180 = vector.extract_strided_slice %178 {offsets = [1, 0], sizes = [15, 128], strides = [1, 1]} : vector<16x128xf32> to vector<15x128xf32>
    %181 = arith.maximumf %179, %180 : vector<15x128xf32>
    %182 = arith.addf %176, %181 : vector<15x128xf32>
    %cst_122 = arith.constant dense<0.000000e+00> : vector<128xf32>
    %183 = vector.multi_reduction <add>, %182, %cst_122 [0] : vector<15x128xf32> to vector<128xf32>
    %184 = vector.shape_cast %183 : vector<128xf32> to vector<1x128xf32>
    %cst_123 = arith.constant 0.000000e+00 : f32
    %185 = vector.broadcast %cst_123 : f32 to vector<1x128xf32>
    %186 = arith.maximumf %184, %185 : vector<1x128xf32>
    %cst_124 = arith.constant 1.000000e+00 : f32
    %187 = vector.broadcast %cst_124 : f32 to vector<1x128xf32>
    %188 = arith.addf %186, %187 : vector<1x128xf32>
    %189 = math.log %188 : vector<1x128xf32>
    %cst_125 = arith.constant 2.000000e+00 : f32
    %190 = math.log %cst_125 : f32
    %191 = vector.broadcast %190 : f32 to vector<1x128xf32>
    %192 = arith.divf %189, %191 : vector<1x128xf32>
    %cst_126 = arith.constant 0.898370623 : f32
    %193 = vector.broadcast %cst_126 : f32 to vector<1x128xf32>
    %194 = arith.mulf %192, %193 : vector<1x128xf32>
    %cst_127 = arith.constant 0.000000e+00 : f32
    %195 = vector.broadcast %cst_127 : f32 to vector<14x128xf32>
    %c0_128 = arith.constant 0 : index
    %c0_129 = arith.constant 0 : index
    %c0_130 = arith.constant 0 : index
    %196 = vector.load %arg3[%c0_128, %c0_129, %c0_130] : memref<15x16x128xf32, #tpu.memory_space<vmem>>, vector<1x16x128xf32>
    %197 = vector.shape_cast %196 : vector<1x16x128xf32> to vector<16x128xf32>
    %c1_131 = arith.constant 1 : index
    %c0_132 = arith.constant 0 : index
    %c0_133 = arith.constant 0 : index
    %198 = vector.load %arg3[%c1_131, %c0_132, %c0_133] : memref<15x16x128xf32, #tpu.memory_space<vmem>>, vector<1x16x128xf32>
    %199 = vector.shape_cast %198 : vector<1x16x128xf32> to vector<16x128xf32>
    %200 = arith.maximumf %197, %199 : vector<16x128xf32>
    %201 = vector.extract_strided_slice %200 {offsets = [0, 0], sizes = [15, 128], strides = [1, 1]} : vector<16x128xf32> to vector<15x128xf32>
    %202 = vector.extract_strided_slice %200 {offsets = [1, 0], sizes = [15, 128], strides = [1, 1]} : vector<16x128xf32> to vector<15x128xf32>
    %203 = arith.maximumf %201, %202 : vector<15x128xf32>
    %204 = vector.extract_strided_slice %203 {offsets = [0, 0], sizes = [14, 128], strides = [1, 1]} : vector<15x128xf32> to vector<14x128xf32>
    %205 = vector.extract_strided_slice %203 {offsets = [1, 0], sizes = [14, 128], strides = [1, 1]} : vector<15x128xf32> to vector<14x128xf32>
    %206 = arith.maximumf %204, %205 : vector<14x128xf32>
    %207 = arith.addf %195, %206 : vector<14x128xf32>
    %c1_134 = arith.constant 1 : index
    %c0_135 = arith.constant 0 : index
    %c0_136 = arith.constant 0 : index
    %208 = vector.load %arg3[%c1_134, %c0_135, %c0_136] : memref<15x16x128xf32, #tpu.memory_space<vmem>>, vector<1x16x128xf32>
    %209 = vector.shape_cast %208 : vector<1x16x128xf32> to vector<16x128xf32>
    %c2_137 = arith.constant 2 : index
    %c0_138 = arith.constant 0 : index
    %c0_139 = arith.constant 0 : index
    %210 = vector.load %arg3[%c2_137, %c0_138, %c0_139] : memref<15x16x128xf32, #tpu.memory_space<vmem>>, vector<1x16x128xf32>
    %211 = vector.shape_cast %210 : vector<1x16x128xf32> to vector<16x128xf32>
    %212 = arith.maximumf %209, %211 : vector<16x128xf32>
    %213 = vector.extract_strided_slice %212 {offsets = [0, 0], sizes = [15, 128], strides = [1, 1]} : vector<16x128xf32> to vector<15x128xf32>
    %214 = vector.extract_strided_slice %212 {offsets = [1, 0], sizes = [15, 128], strides = [1, 1]} : vector<16x128xf32> to vector<15x128xf32>
    %215 = arith.maximumf %213, %214 : vector<15x128xf32>
    %216 = vector.extract_strided_slice %215 {offsets = [0, 0], sizes = [14, 128], strides = [1, 1]} : vector<15x128xf32> to vector<14x128xf32>
    %217 = vector.extract_strided_slice %215 {offsets = [1, 0], sizes = [14, 128], strides = [1, 1]} : vector<15x128xf32> to vector<14x128xf32>
    %218 = arith.maximumf %216, %217 : vector<14x128xf32>
    %219 = arith.addf %207, %218 : vector<14x128xf32>
    %c2_140 = arith.constant 2 : index
    %c0_141 = arith.constant 0 : index
    %c0_142 = arith.constant 0 : index
    %220 = vector.load %arg3[%c2_140, %c0_141, %c0_142] : memref<15x16x128xf32, #tpu.memory_space<vmem>>, vector<1x16x128xf32>
    %221 = vector.shape_cast %220 : vector<1x16x128xf32> to vector<16x128xf32>
    %c3_143 = arith.constant 3 : index
    %c0_144 = arith.constant 0 : index
    %c0_145 = arith.constant 0 : index
    %222 = vector.load %arg3[%c3_143, %c0_144, %c0_145] : memref<15x16x128xf32, #tpu.memory_space<vmem>>, vector<1x16x128xf32>
    %223 = vector.shape_cast %222 : vector<1x16x128xf32> to vector<16x128xf32>
    %224 = arith.maximumf %221, %223 : vector<16x128xf32>
    %225 = vector.extract_strided_slice %224 {offsets = [0, 0], sizes = [15, 128], strides = [1, 1]} : vector<16x128xf32> to vector<15x128xf32>
    %226 = vector.extract_strided_slice %224 {offsets = [1, 0], sizes = [15, 128], strides = [1, 1]} : vector<16x128xf32> to vector<15x128xf32>
    %227 = arith.maximumf %225, %226 : vector<15x128xf32>
    %228 = vector.extract_strided_slice %227 {offsets = [0, 0], sizes = [14, 128], strides = [1, 1]} : vector<15x128xf32> to vector<14x128xf32>
    %229 = vector.extract_strided_slice %227 {offsets = [1, 0], sizes = [14, 128], strides = [1, 1]} : vector<15x128xf32> to vector<14x128xf32>
    %230 = arith.maximumf %228, %229 : vector<14x128xf32>
    %231 = arith.addf %219, %230 : vector<14x128xf32>
    %c3_146 = arith.constant 3 : index
    %c0_147 = arith.constant 0 : index
    %c0_148 = arith.constant 0 : index
    %232 = vector.load %arg3[%c3_146, %c0_147, %c0_148] : memref<15x16x128xf32, #tpu.memory_space<vmem>>, vector<1x16x128xf32>
    %233 = vector.shape_cast %232 : vector<1x16x128xf32> to vector<16x128xf32>
    %c4_149 = arith.constant 4 : index
    %c0_150 = arith.constant 0 : index
    %c0_151 = arith.constant 0 : index
    %234 = vector.load %arg3[%c4_149, %c0_150, %c0_151] : memref<15x16x128xf32, #tpu.memory_space<vmem>>, vector<1x16x128xf32>
    %235 = vector.shape_cast %234 : vector<1x16x128xf32> to vector<16x128xf32>
    %236 = arith.maximumf %233, %235 : vector<16x128xf32>
    %237 = vector.extract_strided_slice %236 {offsets = [0, 0], sizes = [15, 128], strides = [1, 1]} : vector<16x128xf32> to vector<15x128xf32>
    %238 = vector.extract_strided_slice %236 {offsets = [1, 0], sizes = [15, 128], strides = [1, 1]} : vector<16x128xf32> to vector<15x128xf32>
    %239 = arith.maximumf %237, %238 : vector<15x128xf32>
    %240 = vector.extract_strided_slice %239 {offsets = [0, 0], sizes = [14, 128], strides = [1, 1]} : vector<15x128xf32> to vector<14x128xf32>
    %241 = vector.extract_strided_slice %239 {offsets = [1, 0], sizes = [14, 128], strides = [1, 1]} : vector<15x128xf32> to vector<14x128xf32>
    %242 = arith.maximumf %240, %241 : vector<14x128xf32>
    %243 = arith.addf %231, %242 : vector<14x128xf32>
    %c4_152 = arith.constant 4 : index
    %c0_153 = arith.constant 0 : index
    %c0_154 = arith.constant 0 : index
    %244 = vector.load %arg3[%c4_152, %c0_153, %c0_154] : memref<15x16x128xf32, #tpu.memory_space<vmem>>, vector<1x16x128xf32>
    %245 = vector.shape_cast %244 : vector<1x16x128xf32> to vector<16x128xf32>
    %c5_155 = arith.constant 5 : index
    %c0_156 = arith.constant 0 : index
    %c0_157 = arith.constant 0 : index
    %246 = vector.load %arg3[%c5_155, %c0_156, %c0_157] : memref<15x16x128xf32, #tpu.memory_space<vmem>>, vector<1x16x128xf32>
    %247 = vector.shape_cast %246 : vector<1x16x128xf32> to vector<16x128xf32>
    %248 = arith.maximumf %245, %247 : vector<16x128xf32>
    %249 = vector.extract_strided_slice %248 {offsets = [0, 0], sizes = [15, 128], strides = [1, 1]} : vector<16x128xf32> to vector<15x128xf32>
    %250 = vector.extract_strided_slice %248 {offsets = [1, 0], sizes = [15, 128], strides = [1, 1]} : vector<16x128xf32> to vector<15x128xf32>
    %251 = arith.maximumf %249, %250 : vector<15x128xf32>
    %252 = vector.extract_strided_slice %251 {offsets = [0, 0], sizes = [14, 128], strides = [1, 1]} : vector<15x128xf32> to vector<14x128xf32>
    %253 = vector.extract_strided_slice %251 {offsets = [1, 0], sizes = [14, 128], strides = [1, 1]} : vector<15x128xf32> to vector<14x128xf32>
    %254 = arith.maximumf %252, %253 : vector<14x128xf32>
    %255 = arith.addf %243, %254 : vector<14x128xf32>
    %c5_158 = arith.constant 5 : index
    %c0_159 = arith.constant 0 : index
    %c0_160 = arith.constant 0 : index
    %256 = vector.load %arg3[%c5_158, %c0_159, %c0_160] : memref<15x16x128xf32, #tpu.memory_space<vmem>>, vector<1x16x128xf32>
    %257 = vector.shape_cast %256 : vector<1x16x128xf32> to vector<16x128xf32>
    %c6_161 = arith.constant 6 : index
    %c0_162 = arith.constant 0 : index
    %c0_163 = arith.constant 0 : index
    %258 = vector.load %arg3[%c6_161, %c0_162, %c0_163] : memref<15x16x128xf32, #tpu.memory_space<vmem>>, vector<1x16x128xf32>
    %259 = vector.shape_cast %258 : vector<1x16x128xf32> to vector<16x128xf32>
    %260 = arith.maximumf %257, %259 : vector<16x128xf32>
    %261 = vector.extract_strided_slice %260 {offsets = [0, 0], sizes = [15, 128], strides = [1, 1]} : vector<16x128xf32> to vector<15x128xf32>
    %262 = vector.extract_strided_slice %260 {offsets = [1, 0], sizes = [15, 128], strides = [1, 1]} : vector<16x128xf32> to vector<15x128xf32>
    %263 = arith.maximumf %261, %262 : vector<15x128xf32>
    %264 = vector.extract_strided_slice %263 {offsets = [0, 0], sizes = [14, 128], strides = [1, 1]} : vector<15x128xf32> to vector<14x128xf32>
    %265 = vector.extract_strided_slice %263 {offsets = [1, 0], sizes = [14, 128], strides = [1, 1]} : vector<15x128xf32> to vector<14x128xf32>
    %266 = arith.maximumf %264, %265 : vector<14x128xf32>
    %267 = arith.addf %255, %266 : vector<14x128xf32>
    %c6_164 = arith.constant 6 : index
    %c0_165 = arith.constant 0 : index
    %c0_166 = arith.constant 0 : index
    %268 = vector.load %arg3[%c6_164, %c0_165, %c0_166] : memref<15x16x128xf32, #tpu.memory_space<vmem>>, vector<1x16x128xf32>
    %269 = vector.shape_cast %268 : vector<1x16x128xf32> to vector<16x128xf32>
    %c7_167 = arith.constant 7 : index
    %c0_168 = arith.constant 0 : index
    %c0_169 = arith.constant 0 : index
    %270 = vector.load %arg3[%c7_167, %c0_168, %c0_169] : memref<15x16x128xf32, #tpu.memory_space<vmem>>, vector<1x16x128xf32>
    %271 = vector.shape_cast %270 : vector<1x16x128xf32> to vector<16x128xf32>
    %272 = arith.maximumf %269, %271 : vector<16x128xf32>
    %273 = vector.extract_strided_slice %272 {offsets = [0, 0], sizes = [15, 128], strides = [1, 1]} : vector<16x128xf32> to vector<15x128xf32>
    %274 = vector.extract_strided_slice %272 {offsets = [1, 0], sizes = [15, 128], strides = [1, 1]} : vector<16x128xf32> to vector<15x128xf32>
    %275 = arith.maximumf %273, %274 : vector<15x128xf32>
    %276 = vector.extract_strided_slice %275 {offsets = [0, 0], sizes = [14, 128], strides = [1, 1]} : vector<15x128xf32> to vector<14x128xf32>
    %277 = vector.extract_strided_slice %275 {offsets = [1, 0], sizes = [14, 128], strides = [1, 1]} : vector<15x128xf32> to vector<14x128xf32>
    %278 = arith.maximumf %276, %277 : vector<14x128xf32>
    %279 = arith.addf %267, %278 : vector<14x128xf32>
    %c7_170 = arith.constant 7 : index
    %c0_171 = arith.constant 0 : index
    %c0_172 = arith.constant 0 : index
    %280 = vector.load %arg3[%c7_170, %c0_171, %c0_172] : memref<15x16x128xf32, #tpu.memory_space<vmem>>, vector<1x16x128xf32>
    %281 = vector.shape_cast %280 : vector<1x16x128xf32> to vector<16x128xf32>
    %c8_173 = arith.constant 8 : index
    %c0_174 = arith.constant 0 : index
    %c0_175 = arith.constant 0 : index
    %282 = vector.load %arg3[%c8_173, %c0_174, %c0_175] : memref<15x16x128xf32, #tpu.memory_space<vmem>>, vector<1x16x128xf32>
    %283 = vector.shape_cast %282 : vector<1x16x128xf32> to vector<16x128xf32>
    %284 = arith.maximumf %281, %283 : vector<16x128xf32>
    %285 = vector.extract_strided_slice %284 {offsets = [0, 0], sizes = [15, 128], strides = [1, 1]} : vector<16x128xf32> to vector<15x128xf32>
    %286 = vector.extract_strided_slice %284 {offsets = [1, 0], sizes = [15, 128], strides = [1, 1]} : vector<16x128xf32> to vector<15x128xf32>
    %287 = arith.maximumf %285, %286 : vector<15x128xf32>
    %288 = vector.extract_strided_slice %287 {offsets = [0, 0], sizes = [14, 128], strides = [1, 1]} : vector<15x128xf32> to vector<14x128xf32>
    %289 = vector.extract_strided_slice %287 {offsets = [1, 0], sizes = [14, 128], strides = [1, 1]} : vector<15x128xf32> to vector<14x128xf32>
    %290 = arith.maximumf %288, %289 : vector<14x128xf32>
    %291 = arith.addf %279, %290 : vector<14x128xf32>
    %c8_176 = arith.constant 8 : index
    %c0_177 = arith.constant 0 : index
    %c0_178 = arith.constant 0 : index
    %292 = vector.load %arg3[%c8_176, %c0_177, %c0_178] : memref<15x16x128xf32, #tpu.memory_space<vmem>>, vector<1x16x128xf32>
    %293 = vector.shape_cast %292 : vector<1x16x128xf32> to vector<16x128xf32>
    %c9_179 = arith.constant 9 : index
    %c0_180 = arith.constant 0 : index
    %c0_181 = arith.constant 0 : index
    %294 = vector.load %arg3[%c9_179, %c0_180, %c0_181] : memref<15x16x128xf32, #tpu.memory_space<vmem>>, vector<1x16x128xf32>
    %295 = vector.shape_cast %294 : vector<1x16x128xf32> to vector<16x128xf32>
    %296 = arith.maximumf %293, %295 : vector<16x128xf32>
    %297 = vector.extract_strided_slice %296 {offsets = [0, 0], sizes = [15, 128], strides = [1, 1]} : vector<16x128xf32> to vector<15x128xf32>
    %298 = vector.extract_strided_slice %296 {offsets = [1, 0], sizes = [15, 128], strides = [1, 1]} : vector<16x128xf32> to vector<15x128xf32>
    %299 = arith.maximumf %297, %298 : vector<15x128xf32>
    %300 = vector.extract_strided_slice %299 {offsets = [0, 0], sizes = [14, 128], strides = [1, 1]} : vector<15x128xf32> to vector<14x128xf32>
    %301 = vector.extract_strided_slice %299 {offsets = [1, 0], sizes = [14, 128], strides = [1, 1]} : vector<15x128xf32> to vector<14x128xf32>
    %302 = arith.maximumf %300, %301 : vector<14x128xf32>
    %303 = arith.addf %291, %302 : vector<14x128xf32>
    %c9_182 = arith.constant 9 : index
    %c0_183 = arith.constant 0 : index
    %c0_184 = arith.constant 0 : index
    %304 = vector.load %arg3[%c9_182, %c0_183, %c0_184] : memref<15x16x128xf32, #tpu.memory_space<vmem>>, vector<1x16x128xf32>
    %305 = vector.shape_cast %304 : vector<1x16x128xf32> to vector<16x128xf32>
    %c10_185 = arith.constant 10 : index
    %c0_186 = arith.constant 0 : index
    %c0_187 = arith.constant 0 : index
    %306 = vector.load %arg3[%c10_185, %c0_186, %c0_187] : memref<15x16x128xf32, #tpu.memory_space<vmem>>, vector<1x16x128xf32>
    %307 = vector.shape_cast %306 : vector<1x16x128xf32> to vector<16x128xf32>
    %308 = arith.maximumf %305, %307 : vector<16x128xf32>
    %309 = vector.extract_strided_slice %308 {offsets = [0, 0], sizes = [15, 128], strides = [1, 1]} : vector<16x128xf32> to vector<15x128xf32>
    %310 = vector.extract_strided_slice %308 {offsets = [1, 0], sizes = [15, 128], strides = [1, 1]} : vector<16x128xf32> to vector<15x128xf32>
    %311 = arith.maximumf %309, %310 : vector<15x128xf32>
    %312 = vector.extract_strided_slice %311 {offsets = [0, 0], sizes = [14, 128], strides = [1, 1]} : vector<15x128xf32> to vector<14x128xf32>
    %313 = vector.extract_strided_slice %311 {offsets = [1, 0], sizes = [14, 128], strides = [1, 1]} : vector<15x128xf32> to vector<14x128xf32>
    %314 = arith.maximumf %312, %313 : vector<14x128xf32>
    %315 = arith.addf %303, %314 : vector<14x128xf32>
    %c10_188 = arith.constant 10 : index
    %c0_189 = arith.constant 0 : index
    %c0_190 = arith.constant 0 : index
    %316 = vector.load %arg3[%c10_188, %c0_189, %c0_190] : memref<15x16x128xf32, #tpu.memory_space<vmem>>, vector<1x16x128xf32>
    %317 = vector.shape_cast %316 : vector<1x16x128xf32> to vector<16x128xf32>
    %c11_191 = arith.constant 11 : index
    %c0_192 = arith.constant 0 : index
    %c0_193 = arith.constant 0 : index
    %318 = vector.load %arg3[%c11_191, %c0_192, %c0_193] : memref<15x16x128xf32, #tpu.memory_space<vmem>>, vector<1x16x128xf32>
    %319 = vector.shape_cast %318 : vector<1x16x128xf32> to vector<16x128xf32>
    %320 = arith.maximumf %317, %319 : vector<16x128xf32>
    %321 = vector.extract_strided_slice %320 {offsets = [0, 0], sizes = [15, 128], strides = [1, 1]} : vector<16x128xf32> to vector<15x128xf32>
    %322 = vector.extract_strided_slice %320 {offsets = [1, 0], sizes = [15, 128], strides = [1, 1]} : vector<16x128xf32> to vector<15x128xf32>
    %323 = arith.maximumf %321, %322 : vector<15x128xf32>
    %324 = vector.extract_strided_slice %323 {offsets = [0, 0], sizes = [14, 128], strides = [1, 1]} : vector<15x128xf32> to vector<14x128xf32>
    %325 = vector.extract_strided_slice %323 {offsets = [1, 0], sizes = [14, 128], strides = [1, 1]} : vector<15x128xf32> to vector<14x128xf32>
    %326 = arith.maximumf %324, %325 : vector<14x128xf32>
    %327 = arith.addf %315, %326 : vector<14x128xf32>
    %c11_194 = arith.constant 11 : index
    %c0_195 = arith.constant 0 : index
    %c0_196 = arith.constant 0 : index
    %328 = vector.load %arg3[%c11_194, %c0_195, %c0_196] : memref<15x16x128xf32, #tpu.memory_space<vmem>>, vector<1x16x128xf32>
    %329 = vector.shape_cast %328 : vector<1x16x128xf32> to vector<16x128xf32>
    %c12_197 = arith.constant 12 : index
    %c0_198 = arith.constant 0 : index
    %c0_199 = arith.constant 0 : index
    %330 = vector.load %arg3[%c12_197, %c0_198, %c0_199] : memref<15x16x128xf32, #tpu.memory_space<vmem>>, vector<1x16x128xf32>
    %331 = vector.shape_cast %330 : vector<1x16x128xf32> to vector<16x128xf32>
    %332 = arith.maximumf %329, %331 : vector<16x128xf32>
    %333 = vector.extract_strided_slice %332 {offsets = [0, 0], sizes = [15, 128], strides = [1, 1]} : vector<16x128xf32> to vector<15x128xf32>
    %334 = vector.extract_strided_slice %332 {offsets = [1, 0], sizes = [15, 128], strides = [1, 1]} : vector<16x128xf32> to vector<15x128xf32>
    %335 = arith.maximumf %333, %334 : vector<15x128xf32>
    %336 = vector.extract_strided_slice %335 {offsets = [0, 0], sizes = [14, 128], strides = [1, 1]} : vector<15x128xf32> to vector<14x128xf32>
    %337 = vector.extract_strided_slice %335 {offsets = [1, 0], sizes = [14, 128], strides = [1, 1]} : vector<15x128xf32> to vector<14x128xf32>
    %338 = arith.maximumf %336, %337 : vector<14x128xf32>
    %339 = arith.addf %327, %338 : vector<14x128xf32>
    %c12_200 = arith.constant 12 : index
    %c0_201 = arith.constant 0 : index
    %c0_202 = arith.constant 0 : index
    %340 = vector.load %arg3[%c12_200, %c0_201, %c0_202] : memref<15x16x128xf32, #tpu.memory_space<vmem>>, vector<1x16x128xf32>
    %341 = vector.shape_cast %340 : vector<1x16x128xf32> to vector<16x128xf32>
    %c13_203 = arith.constant 13 : index
    %c0_204 = arith.constant 0 : index
    %c0_205 = arith.constant 0 : index
    %342 = vector.load %arg3[%c13_203, %c0_204, %c0_205] : memref<15x16x128xf32, #tpu.memory_space<vmem>>, vector<1x16x128xf32>
    %343 = vector.shape_cast %342 : vector<1x16x128xf32> to vector<16x128xf32>
    %344 = arith.maximumf %341, %343 : vector<16x128xf32>
    %345 = vector.extract_strided_slice %344 {offsets = [0, 0], sizes = [15, 128], strides = [1, 1]} : vector<16x128xf32> to vector<15x128xf32>
    %346 = vector.extract_strided_slice %344 {offsets = [1, 0], sizes = [15, 128], strides = [1, 1]} : vector<16x128xf32> to vector<15x128xf32>
    %347 = arith.maximumf %345, %346 : vector<15x128xf32>
    %348 = vector.extract_strided_slice %347 {offsets = [0, 0], sizes = [14, 128], strides = [1, 1]} : vector<15x128xf32> to vector<14x128xf32>
    %349 = vector.extract_strided_slice %347 {offsets = [1, 0], sizes = [14, 128], strides = [1, 1]} : vector<15x128xf32> to vector<14x128xf32>
    %350 = arith.maximumf %348, %349 : vector<14x128xf32>
    %351 = arith.addf %339, %350 : vector<14x128xf32>
    %c13_206 = arith.constant 13 : index
    %c0_207 = arith.constant 0 : index
    %c0_208 = arith.constant 0 : index
    %352 = vector.load %arg3[%c13_206, %c0_207, %c0_208] : memref<15x16x128xf32, #tpu.memory_space<vmem>>, vector<1x16x128xf32>
    %353 = vector.shape_cast %352 : vector<1x16x128xf32> to vector<16x128xf32>
    %c14_209 = arith.constant 14 : index
    %c0_210 = arith.constant 0 : index
    %c0_211 = arith.constant 0 : index
    %354 = vector.load %arg3[%c14_209, %c0_210, %c0_211] : memref<15x16x128xf32, #tpu.memory_space<vmem>>, vector<1x16x128xf32>
    %355 = vector.shape_cast %354 : vector<1x16x128xf32> to vector<16x128xf32>
    %356 = arith.maximumf %353, %355 : vector<16x128xf32>
    %357 = vector.extract_strided_slice %356 {offsets = [0, 0], sizes = [15, 128], strides = [1, 1]} : vector<16x128xf32> to vector<15x128xf32>
    %358 = vector.extract_strided_slice %356 {offsets = [1, 0], sizes = [15, 128], strides = [1, 1]} : vector<16x128xf32> to vector<15x128xf32>
    %359 = arith.maximumf %357, %358 : vector<15x128xf32>
    %360 = vector.extract_strided_slice %359 {offsets = [0, 0], sizes = [14, 128], strides = [1, 1]} : vector<15x128xf32> to vector<14x128xf32>
    %361 = vector.extract_strided_slice %359 {offsets = [1, 0], sizes = [14, 128], strides = [1, 1]} : vector<15x128xf32> to vector<14x128xf32>
    %362 = arith.maximumf %360, %361 : vector<14x128xf32>
    %363 = arith.addf %351, %362 : vector<14x128xf32>
    %cst_212 = arith.constant dense<0.000000e+00> : vector<128xf32>
    %364 = vector.multi_reduction <add>, %363, %cst_212 [0] : vector<14x128xf32> to vector<128xf32>
    %365 = vector.shape_cast %364 : vector<128xf32> to vector<1x128xf32>
    %cst_213 = arith.constant 0.000000e+00 : f32
    %366 = vector.broadcast %cst_213 : f32 to vector<1x128xf32>
    %367 = arith.maximumf %365, %366 : vector<1x128xf32>
    %cst_214 = arith.constant 1.000000e+00 : f32
    %368 = vector.broadcast %cst_214 : f32 to vector<1x128xf32>
    %369 = arith.addf %367, %368 : vector<1x128xf32>
    %370 = math.log %369 : vector<1x128xf32>
    %cst_215 = arith.constant 2.000000e+00 : f32
    %371 = math.log %cst_215 : f32
    %372 = vector.broadcast %371 : f32 to vector<1x128xf32>
    %373 = arith.divf %370, %372 : vector<1x128xf32>
    %cst_216 = arith.constant 0.313408107 : f32
    %374 = vector.broadcast %cst_216 : f32 to vector<1x128xf32>
    %375 = arith.mulf %373, %374 : vector<1x128xf32>
    %376 = arith.addf %194, %375 : vector<1x128xf32>
    %cst_217 = arith.constant 0.000000e+00 : f32
    %377 = vector.broadcast %cst_217 : f32 to vector<13x128xf32>
    %c0_218 = arith.constant 0 : index
    %c0_219 = arith.constant 0 : index
    %c0_220 = arith.constant 0 : index
    %378 = vector.load %arg3[%c0_218, %c0_219, %c0_220] : memref<15x16x128xf32, #tpu.memory_space<vmem>>, vector<1x16x128xf32>
    %379 = vector.shape_cast %378 : vector<1x16x128xf32> to vector<16x128xf32>
    %c2_221 = arith.constant 2 : index
    %c0_222 = arith.constant 0 : index
    %c0_223 = arith.constant 0 : index
    %380 = vector.load %arg3[%c2_221, %c0_222, %c0_223] : memref<15x16x128xf32, #tpu.memory_space<vmem>>, vector<1x16x128xf32>
    %381 = vector.shape_cast %380 : vector<1x16x128xf32> to vector<16x128xf32>
    %382 = arith.maximumf %379, %381 : vector<16x128xf32>
    %383 = vector.extract_strided_slice %382 {offsets = [0, 0], sizes = [15, 128], strides = [1, 1]} : vector<16x128xf32> to vector<15x128xf32>
    %384 = vector.extract_strided_slice %382 {offsets = [1, 0], sizes = [15, 128], strides = [1, 1]} : vector<16x128xf32> to vector<15x128xf32>
    %385 = arith.maximumf %383, %384 : vector<15x128xf32>
    %386 = vector.extract_strided_slice %385 {offsets = [0, 0], sizes = [13, 128], strides = [1, 1]} : vector<15x128xf32> to vector<13x128xf32>
    %387 = vector.extract_strided_slice %385 {offsets = [2, 0], sizes = [13, 128], strides = [1, 1]} : vector<15x128xf32> to vector<13x128xf32>
    %388 = arith.maximumf %386, %387 : vector<13x128xf32>
    %389 = arith.addf %377, %388 : vector<13x128xf32>
    %c2_224 = arith.constant 2 : index
    %c0_225 = arith.constant 0 : index
    %c0_226 = arith.constant 0 : index
    %390 = vector.load %arg3[%c2_224, %c0_225, %c0_226] : memref<15x16x128xf32, #tpu.memory_space<vmem>>, vector<1x16x128xf32>
    %391 = vector.shape_cast %390 : vector<1x16x128xf32> to vector<16x128xf32>
    %c4_227 = arith.constant 4 : index
    %c0_228 = arith.constant 0 : index
    %c0_229 = arith.constant 0 : index
    %392 = vector.load %arg3[%c4_227, %c0_228, %c0_229] : memref<15x16x128xf32, #tpu.memory_space<vmem>>, vector<1x16x128xf32>
    %393 = vector.shape_cast %392 : vector<1x16x128xf32> to vector<16x128xf32>
    %394 = arith.maximumf %391, %393 : vector<16x128xf32>
    %395 = vector.extract_strided_slice %394 {offsets = [0, 0], sizes = [15, 128], strides = [1, 1]} : vector<16x128xf32> to vector<15x128xf32>
    %396 = vector.extract_strided_slice %394 {offsets = [1, 0], sizes = [15, 128], strides = [1, 1]} : vector<16x128xf32> to vector<15x128xf32>
    %397 = arith.maximumf %395, %396 : vector<15x128xf32>
    %398 = vector.extract_strided_slice %397 {offsets = [0, 0], sizes = [13, 128], strides = [1, 1]} : vector<15x128xf32> to vector<13x128xf32>
    %399 = vector.extract_strided_slice %397 {offsets = [2, 0], sizes = [13, 128], strides = [1, 1]} : vector<15x128xf32> to vector<13x128xf32>
    %400 = arith.maximumf %398, %399 : vector<13x128xf32>
    %401 = arith.addf %389, %400 : vector<13x128xf32>
    %c4_230 = arith.constant 4 : index
    %c0_231 = arith.constant 0 : index
    %c0_232 = arith.constant 0 : index
    %402 = vector.load %arg3[%c4_230, %c0_231, %c0_232] : memref<15x16x128xf32, #tpu.memory_space<vmem>>, vector<1x16x128xf32>
    %403 = vector.shape_cast %402 : vector<1x16x128xf32> to vector<16x128xf32>
    %c6_233 = arith.constant 6 : index
    %c0_234 = arith.constant 0 : index
    %c0_235 = arith.constant 0 : index
    %404 = vector.load %arg3[%c6_233, %c0_234, %c0_235] : memref<15x16x128xf32, #tpu.memory_space<vmem>>, vector<1x16x128xf32>
    %405 = vector.shape_cast %404 : vector<1x16x128xf32> to vector<16x128xf32>
    %406 = arith.maximumf %403, %405 : vector<16x128xf32>
    %407 = vector.extract_strided_slice %406 {offsets = [0, 0], sizes = [15, 128], strides = [1, 1]} : vector<16x128xf32> to vector<15x128xf32>
    %408 = vector.extract_strided_slice %406 {offsets = [1, 0], sizes = [15, 128], strides = [1, 1]} : vector<16x128xf32> to vector<15x128xf32>
    %409 = arith.maximumf %407, %408 : vector<15x128xf32>
    %410 = vector.extract_strided_slice %409 {offsets = [0, 0], sizes = [13, 128], strides = [1, 1]} : vector<15x128xf32> to vector<13x128xf32>
    %411 = vector.extract_strided_slice %409 {offsets = [2, 0], sizes = [13, 128], strides = [1, 1]} : vector<15x128xf32> to vector<13x128xf32>
    %412 = arith.maximumf %410, %411 : vector<13x128xf32>
    %413 = arith.addf %401, %412 : vector<13x128xf32>
    %c6_236 = arith.constant 6 : index
    %c0_237 = arith.constant 0 : index
    %c0_238 = arith.constant 0 : index
    %414 = vector.load %arg3[%c6_236, %c0_237, %c0_238] : memref<15x16x128xf32, #tpu.memory_space<vmem>>, vector<1x16x128xf32>
    %415 = vector.shape_cast %414 : vector<1x16x128xf32> to vector<16x128xf32>
    %c8_239 = arith.constant 8 : index
    %c0_240 = arith.constant 0 : index
    %c0_241 = arith.constant 0 : index
    %416 = vector.load %arg3[%c8_239, %c0_240, %c0_241] : memref<15x16x128xf32, #tpu.memory_space<vmem>>, vector<1x16x128xf32>
    %417 = vector.shape_cast %416 : vector<1x16x128xf32> to vector<16x128xf32>
    %418 = arith.maximumf %415, %417 : vector<16x128xf32>
    %419 = vector.extract_strided_slice %418 {offsets = [0, 0], sizes = [15, 128], strides = [1, 1]} : vector<16x128xf32> to vector<15x128xf32>
    %420 = vector.extract_strided_slice %418 {offsets = [1, 0], sizes = [15, 128], strides = [1, 1]} : vector<16x128xf32> to vector<15x128xf32>
    %421 = arith.maximumf %419, %420 : vector<15x128xf32>
    %422 = vector.extract_strided_slice %421 {offsets = [0, 0], sizes = [13, 128], strides = [1, 1]} : vector<15x128xf32> to vector<13x128xf32>
    %423 = vector.extract_strided_slice %421 {offsets = [2, 0], sizes = [13, 128], strides = [1, 1]} : vector<15x128xf32> to vector<13x128xf32>
    %424 = arith.maximumf %422, %423 : vector<13x128xf32>
    %425 = arith.addf %413, %424 : vector<13x128xf32>
    %c8_242 = arith.constant 8 : index
    %c0_243 = arith.constant 0 : index
    %c0_244 = arith.constant 0 : index
    %426 = vector.load %arg3[%c8_242, %c0_243, %c0_244] : memref<15x16x128xf32, #tpu.memory_space<vmem>>, vector<1x16x128xf32>
    %427 = vector.shape_cast %426 : vector<1x16x128xf32> to vector<16x128xf32>
    %c10_245 = arith.constant 10 : index
    %c0_246 = arith.constant 0 : index
    %c0_247 = arith.constant 0 : index
    %428 = vector.load %arg3[%c10_245, %c0_246, %c0_247] : memref<15x16x128xf32, #tpu.memory_space<vmem>>, vector<1x16x128xf32>
    %429 = vector.shape_cast %428 : vector<1x16x128xf32> to vector<16x128xf32>
    %430 = arith.maximumf %427, %429 : vector<16x128xf32>
    %431 = vector.extract_strided_slice %430 {offsets = [0, 0], sizes = [15, 128], strides = [1, 1]} : vector<16x128xf32> to vector<15x128xf32>
    %432 = vector.extract_strided_slice %430 {offsets = [1, 0], sizes = [15, 128], strides = [1, 1]} : vector<16x128xf32> to vector<15x128xf32>
    %433 = arith.maximumf %431, %432 : vector<15x128xf32>
    %434 = vector.extract_strided_slice %433 {offsets = [0, 0], sizes = [13, 128], strides = [1, 1]} : vector<15x128xf32> to vector<13x128xf32>
    %435 = vector.extract_strided_slice %433 {offsets = [2, 0], sizes = [13, 128], strides = [1, 1]} : vector<15x128xf32> to vector<13x128xf32>
    %436 = arith.maximumf %434, %435 : vector<13x128xf32>
    %437 = arith.addf %425, %436 : vector<13x128xf32>
    %c10_248 = arith.constant 10 : index
    %c0_249 = arith.constant 0 : index
    %c0_250 = arith.constant 0 : index
    %438 = vector.load %arg3[%c10_248, %c0_249, %c0_250] : memref<15x16x128xf32, #tpu.memory_space<vmem>>, vector<1x16x128xf32>
    %439 = vector.shape_cast %438 : vector<1x16x128xf32> to vector<16x128xf32>
    %c12_251 = arith.constant 12 : index
    %c0_252 = arith.constant 0 : index
    %c0_253 = arith.constant 0 : index
    %440 = vector.load %arg3[%c12_251, %c0_252, %c0_253] : memref<15x16x128xf32, #tpu.memory_space<vmem>>, vector<1x16x128xf32>
    %441 = vector.shape_cast %440 : vector<1x16x128xf32> to vector<16x128xf32>
    %442 = arith.maximumf %439, %441 : vector<16x128xf32>
    %443 = vector.extract_strided_slice %442 {offsets = [0, 0], sizes = [15, 128], strides = [1, 1]} : vector<16x128xf32> to vector<15x128xf32>
    %444 = vector.extract_strided_slice %442 {offsets = [1, 0], sizes = [15, 128], strides = [1, 1]} : vector<16x128xf32> to vector<15x128xf32>
    %445 = arith.maximumf %443, %444 : vector<15x128xf32>
    %446 = vector.extract_strided_slice %445 {offsets = [0, 0], sizes = [13, 128], strides = [1, 1]} : vector<15x128xf32> to vector<13x128xf32>
    %447 = vector.extract_strided_slice %445 {offsets = [2, 0], sizes = [13, 128], strides = [1, 1]} : vector<15x128xf32> to vector<13x128xf32>
    %448 = arith.maximumf %446, %447 : vector<13x128xf32>
    %449 = arith.addf %437, %448 : vector<13x128xf32>
    %c12_254 = arith.constant 12 : index
    %c0_255 = arith.constant 0 : index
    %c0_256 = arith.constant 0 : index
    %450 = vector.load %arg3[%c12_254, %c0_255, %c0_256] : memref<15x16x128xf32, #tpu.memory_space<vmem>>, vector<1x16x128xf32>
    %451 = vector.shape_cast %450 : vector<1x16x128xf32> to vector<16x128xf32>
    %c14_257 = arith.constant 14 : index
    %c0_258 = arith.constant 0 : index
    %c0_259 = arith.constant 0 : index
    %452 = vector.load %arg3[%c14_257, %c0_258, %c0_259] : memref<15x16x128xf32, #tpu.memory_space<vmem>>, vector<1x16x128xf32>
    %453 = vector.shape_cast %452 : vector<1x16x128xf32> to vector<16x128xf32>
    %454 = arith.maximumf %451, %453 : vector<16x128xf32>
    %455 = vector.extract_strided_slice %454 {offsets = [0, 0], sizes = [15, 128], strides = [1, 1]} : vector<16x128xf32> to vector<15x128xf32>
    %456 = vector.extract_strided_slice %454 {offsets = [1, 0], sizes = [15, 128], strides = [1, 1]} : vector<16x128xf32> to vector<15x128xf32>
    %457 = arith.maximumf %455, %456 : vector<15x128xf32>
    %458 = vector.extract_strided_slice %457 {offsets = [0, 0], sizes = [13, 128], strides = [1, 1]} : vector<15x128xf32> to vector<13x128xf32>
    %459 = vector.extract_strided_slice %457 {offsets = [2, 0], sizes = [13, 128], strides = [1, 1]} : vector<15x128xf32> to vector<13x128xf32>
    %460 = arith.maximumf %458, %459 : vector<13x128xf32>
    %461 = arith.addf %449, %460 : vector<13x128xf32>
    %462 = tpu.iota {dimensions = array<i32: 0>} : vector<13x128xi32>
    %c2_i32 = arith.constant 2 : i32
    %c0_i32 = arith.constant 0 : i32
    %463 = arith.cmpi eq, %c2_i32, %c0_i32 : i32
    %c1_i32 = arith.constant 1 : i32
    %464 = arith.select %463, %c1_i32, %c2_i32 : i32
    %465 = vector.broadcast %464 : i32 to vector<13x128xi32>
    %466 = arith.remsi %462, %465 : vector<13x128xi32>
    %c0_i32_260 = arith.constant 0 : i32
    %467 = vector.broadcast %c0_i32_260 : i32 to vector<13x128xi32>
    %468 = arith.cmpi ne, %466, %467 : vector<13x128xi32>
    %c0_i32_261 = arith.constant 0 : i32
    %469 = vector.broadcast %c0_i32_261 : i32 to vector<13x128xi32>
    %470 = arith.cmpi slt, %466, %469 : vector<13x128xi32>
    %c0_i32_262 = arith.constant 0 : i32
    %471 = arith.cmpi slt, %464, %c0_i32_262 : i32
    %472 = vector.broadcast %471 : i1 to vector<13x128xi1>
    %473 = vector.broadcast %472 : vector<13x128xi1> to vector<13x128xi1>
    %474 = arith.xori %470, %473 : vector<13x128xi1>
    %475 = arith.andi %474, %468 : vector<13x128xi1>
    %476 = vector.broadcast %464 : i32 to vector<13x128xi32>
    %477 = arith.addi %466, %476 : vector<13x128xi32>
    %478 = arith.select %475, %477, %466 : vector<13x128xi1>, vector<13x128xi32>
    %c0_i32_263 = arith.constant 0 : i32
    %479 = vector.broadcast %c0_i32_263 : i32 to vector<13x128xi32>
    %480 = arith.cmpi eq, %478, %479 : vector<13x128xi32>
    %cst_264 = arith.constant 0.000000e+00 : f32
    %481 = vector.broadcast %cst_264 : f32 to vector<13x128xf32>
    %482 = arith.select %480, %461, %481 : vector<13x128xi1>, vector<13x128xf32>
    %cst_265 = arith.constant dense<0.000000e+00> : vector<128xf32>
    %483 = vector.multi_reduction <add>, %482, %cst_265 [0] : vector<13x128xf32> to vector<128xf32>
    %484 = vector.shape_cast %483 : vector<128xf32> to vector<1x128xf32>
    %cst_266 = arith.constant 0.000000e+00 : f32
    %485 = vector.broadcast %cst_266 : f32 to vector<1x128xf32>
    %486 = arith.maximumf %484, %485 : vector<1x128xf32>
    %cst_267 = arith.constant 1.000000e+00 : f32
    %487 = vector.broadcast %cst_267 : f32 to vector<1x128xf32>
    %488 = arith.addf %486, %487 : vector<1x128xf32>
    %489 = math.log %488 : vector<1x128xf32>
    %cst_268 = arith.constant 2.000000e+00 : f32
    %490 = math.log %cst_268 : f32
    %491 = vector.broadcast %490 : f32 to vector<1x128xf32>
    %492 = arith.divf %489, %491 : vector<1x128xf32>
    %cst_269 = arith.constant -0.101629384 : f32
    %493 = vector.broadcast %cst_269 : f32 to vector<1x128xf32>
    %494 = arith.mulf %492, %493 : vector<1x128xf32>
    %495 = arith.addf %376, %494 : vector<1x128xf32>
    %cst_270 = arith.constant 0.000000e+00 : f32
    %496 = vector.broadcast %cst_270 : f32 to vector<12x128xf32>
    %c0_271 = arith.constant 0 : index
    %c0_272 = arith.constant 0 : index
    %c0_273 = arith.constant 0 : index
    %497 = vector.load %arg3[%c0_271, %c0_272, %c0_273] : memref<15x16x128xf32, #tpu.memory_space<vmem>>, vector<1x16x128xf32>
    %498 = vector.shape_cast %497 : vector<1x16x128xf32> to vector<16x128xf32>
    %c2_274 = arith.constant 2 : index
    %c0_275 = arith.constant 0 : index
    %c0_276 = arith.constant 0 : index
    %499 = vector.load %arg3[%c2_274, %c0_275, %c0_276] : memref<15x16x128xf32, #tpu.memory_space<vmem>>, vector<1x16x128xf32>
    %500 = vector.shape_cast %499 : vector<1x16x128xf32> to vector<16x128xf32>
    %501 = arith.maximumf %498, %500 : vector<16x128xf32>
    %c3_277 = arith.constant 3 : index
    %c0_278 = arith.constant 0 : index
    %c0_279 = arith.constant 0 : index
    %502 = vector.load %arg3[%c3_277, %c0_278, %c0_279] : memref<15x16x128xf32, #tpu.memory_space<vmem>>, vector<1x16x128xf32>
    %503 = vector.shape_cast %502 : vector<1x16x128xf32> to vector<16x128xf32>
    %504 = arith.maximumf %501, %503 : vector<16x128xf32>
    %505 = vector.extract_strided_slice %504 {offsets = [0, 0], sizes = [15, 128], strides = [1, 1]} : vector<16x128xf32> to vector<15x128xf32>
    %506 = vector.extract_strided_slice %504 {offsets = [1, 0], sizes = [15, 128], strides = [1, 1]} : vector<16x128xf32> to vector<15x128xf32>
    %507 = arith.maximumf %505, %506 : vector<15x128xf32>
    %508 = vector.extract_strided_slice %507 {offsets = [0, 0], sizes = [13, 128], strides = [1, 1]} : vector<15x128xf32> to vector<13x128xf32>
    %509 = vector.extract_strided_slice %507 {offsets = [2, 0], sizes = [13, 128], strides = [1, 1]} : vector<15x128xf32> to vector<13x128xf32>
    %510 = arith.maximumf %508, %509 : vector<13x128xf32>
    %511 = vector.extract_strided_slice %510 {offsets = [0, 0], sizes = [12, 128], strides = [1, 1]} : vector<13x128xf32> to vector<12x128xf32>
    %512 = vector.extract_strided_slice %510 {offsets = [1, 0], sizes = [12, 128], strides = [1, 1]} : vector<13x128xf32> to vector<12x128xf32>
    %513 = arith.maximumf %511, %512 : vector<12x128xf32>
    %514 = arith.addf %496, %513 : vector<12x128xf32>
    %c2_280 = arith.constant 2 : index
    %c0_281 = arith.constant 0 : index
    %c0_282 = arith.constant 0 : index
    %515 = vector.load %arg3[%c2_280, %c0_281, %c0_282] : memref<15x16x128xf32, #tpu.memory_space<vmem>>, vector<1x16x128xf32>
    %516 = vector.shape_cast %515 : vector<1x16x128xf32> to vector<16x128xf32>
    %c4_283 = arith.constant 4 : index
    %c0_284 = arith.constant 0 : index
    %c0_285 = arith.constant 0 : index
    %517 = vector.load %arg3[%c4_283, %c0_284, %c0_285] : memref<15x16x128xf32, #tpu.memory_space<vmem>>, vector<1x16x128xf32>
    %518 = vector.shape_cast %517 : vector<1x16x128xf32> to vector<16x128xf32>
    %519 = arith.maximumf %516, %518 : vector<16x128xf32>
    %c5_286 = arith.constant 5 : index
    %c0_287 = arith.constant 0 : index
    %c0_288 = arith.constant 0 : index
    %520 = vector.load %arg3[%c5_286, %c0_287, %c0_288] : memref<15x16x128xf32, #tpu.memory_space<vmem>>, vector<1x16x128xf32>
    %521 = vector.shape_cast %520 : vector<1x16x128xf32> to vector<16x128xf32>
    %522 = arith.maximumf %519, %521 : vector<16x128xf32>
    %523 = vector.extract_strided_slice %522 {offsets = [0, 0], sizes = [15, 128], strides = [1, 1]} : vector<16x128xf32> to vector<15x128xf32>
    %524 = vector.extract_strided_slice %522 {offsets = [1, 0], sizes = [15, 128], strides = [1, 1]} : vector<16x128xf32> to vector<15x128xf32>
    %525 = arith.maximumf %523, %524 : vector<15x128xf32>
    %526 = vector.extract_strided_slice %525 {offsets = [0, 0], sizes = [13, 128], strides = [1, 1]} : vector<15x128xf32> to vector<13x128xf32>
    %527 = vector.extract_strided_slice %525 {offsets = [2, 0], sizes = [13, 128], strides = [1, 1]} : vector<15x128xf32> to vector<13x128xf32>
    %528 = arith.maximumf %526, %527 : vector<13x128xf32>
    %529 = vector.extract_strided_slice %528 {offsets = [0, 0], sizes = [12, 128], strides = [1, 1]} : vector<13x128xf32> to vector<12x128xf32>
    %530 = vector.extract_strided_slice %528 {offsets = [1, 0], sizes = [12, 128], strides = [1, 1]} : vector<13x128xf32> to vector<12x128xf32>
    %531 = arith.maximumf %529, %530 : vector<12x128xf32>
    %532 = arith.addf %514, %531 : vector<12x128xf32>
    %c4_289 = arith.constant 4 : index
    %c0_290 = arith.constant 0 : index
    %c0_291 = arith.constant 0 : index
    %533 = vector.load %arg3[%c4_289, %c0_290, %c0_291] : memref<15x16x128xf32, #tpu.memory_space<vmem>>, vector<1x16x128xf32>
    %534 = vector.shape_cast %533 : vector<1x16x128xf32> to vector<16x128xf32>
    %c6_292 = arith.constant 6 : index
    %c0_293 = arith.constant 0 : index
    %c0_294 = arith.constant 0 : index
    %535 = vector.load %arg3[%c6_292, %c0_293, %c0_294] : memref<15x16x128xf32, #tpu.memory_space<vmem>>, vector<1x16x128xf32>
    %536 = vector.shape_cast %535 : vector<1x16x128xf32> to vector<16x128xf32>
    %537 = arith.maximumf %534, %536 : vector<16x128xf32>
    %c7_295 = arith.constant 7 : index
    %c0_296 = arith.constant 0 : index
    %c0_297 = arith.constant 0 : index
    %538 = vector.load %arg3[%c7_295, %c0_296, %c0_297] : memref<15x16x128xf32, #tpu.memory_space<vmem>>, vector<1x16x128xf32>
    %539 = vector.shape_cast %538 : vector<1x16x128xf32> to vector<16x128xf32>
    %540 = arith.maximumf %537, %539 : vector<16x128xf32>
    %541 = vector.extract_strided_slice %540 {offsets = [0, 0], sizes = [15, 128], strides = [1, 1]} : vector<16x128xf32> to vector<15x128xf32>
    %542 = vector.extract_strided_slice %540 {offsets = [1, 0], sizes = [15, 128], strides = [1, 1]} : vector<16x128xf32> to vector<15x128xf32>
    %543 = arith.maximumf %541, %542 : vector<15x128xf32>
    %544 = vector.extract_strided_slice %543 {offsets = [0, 0], sizes = [13, 128], strides = [1, 1]} : vector<15x128xf32> to vector<13x128xf32>
    %545 = vector.extract_strided_slice %543 {offsets = [2, 0], sizes = [13, 128], strides = [1, 1]} : vector<15x128xf32> to vector<13x128xf32>
    %546 = arith.maximumf %544, %545 : vector<13x128xf32>
    %547 = vector.extract_strided_slice %546 {offsets = [0, 0], sizes = [12, 128], strides = [1, 1]} : vector<13x128xf32> to vector<12x128xf32>
    %548 = vector.extract_strided_slice %546 {offsets = [1, 0], sizes = [12, 128], strides = [1, 1]} : vector<13x128xf32> to vector<12x128xf32>
    %549 = arith.maximumf %547, %548 : vector<12x128xf32>
    %550 = arith.addf %532, %549 : vector<12x128xf32>
    %c6_298 = arith.constant 6 : index
    %c0_299 = arith.constant 0 : index
    %c0_300 = arith.constant 0 : index
    %551 = vector.load %arg3[%c6_298, %c0_299, %c0_300] : memref<15x16x128xf32, #tpu.memory_space<vmem>>, vector<1x16x128xf32>
    %552 = vector.shape_cast %551 : vector<1x16x128xf32> to vector<16x128xf32>
    %c8_301 = arith.constant 8 : index
    %c0_302 = arith.constant 0 : index
    %c0_303 = arith.constant 0 : index
    %553 = vector.load %arg3[%c8_301, %c0_302, %c0_303] : memref<15x16x128xf32, #tpu.memory_space<vmem>>, vector<1x16x128xf32>
    %554 = vector.shape_cast %553 : vector<1x16x128xf32> to vector<16x128xf32>
    %555 = arith.maximumf %552, %554 : vector<16x128xf32>
    %c9_304 = arith.constant 9 : index
    %c0_305 = arith.constant 0 : index
    %c0_306 = arith.constant 0 : index
    %556 = vector.load %arg3[%c9_304, %c0_305, %c0_306] : memref<15x16x128xf32, #tpu.memory_space<vmem>>, vector<1x16x128xf32>
    %557 = vector.shape_cast %556 : vector<1x16x128xf32> to vector<16x128xf32>
    %558 = arith.maximumf %555, %557 : vector<16x128xf32>
    %559 = vector.extract_strided_slice %558 {offsets = [0, 0], sizes = [15, 128], strides = [1, 1]} : vector<16x128xf32> to vector<15x128xf32>
    %560 = vector.extract_strided_slice %558 {offsets = [1, 0], sizes = [15, 128], strides = [1, 1]} : vector<16x128xf32> to vector<15x128xf32>
    %561 = arith.maximumf %559, %560 : vector<15x128xf32>
    %562 = vector.extract_strided_slice %561 {offsets = [0, 0], sizes = [13, 128], strides = [1, 1]} : vector<15x128xf32> to vector<13x128xf32>
    %563 = vector.extract_strided_slice %561 {offsets = [2, 0], sizes = [13, 128], strides = [1, 1]} : vector<15x128xf32> to vector<13x128xf32>
    %564 = arith.maximumf %562, %563 : vector<13x128xf32>
    %565 = vector.extract_strided_slice %564 {offsets = [0, 0], sizes = [12, 128], strides = [1, 1]} : vector<13x128xf32> to vector<12x128xf32>
    %566 = vector.extract_strided_slice %564 {offsets = [1, 0], sizes = [12, 128], strides = [1, 1]} : vector<13x128xf32> to vector<12x128xf32>
    %567 = arith.maximumf %565, %566 : vector<12x128xf32>
    %568 = arith.addf %550, %567 : vector<12x128xf32>
    %c8_307 = arith.constant 8 : index
    %c0_308 = arith.constant 0 : index
    %c0_309 = arith.constant 0 : index
    %569 = vector.load %arg3[%c8_307, %c0_308, %c0_309] : memref<15x16x128xf32, #tpu.memory_space<vmem>>, vector<1x16x128xf32>
    %570 = vector.shape_cast %569 : vector<1x16x128xf32> to vector<16x128xf32>
    %c10_310 = arith.constant 10 : index
    %c0_311 = arith.constant 0 : index
    %c0_312 = arith.constant 0 : index
    %571 = vector.load %arg3[%c10_310, %c0_311, %c0_312] : memref<15x16x128xf32, #tpu.memory_space<vmem>>, vector<1x16x128xf32>
    %572 = vector.shape_cast %571 : vector<1x16x128xf32> to vector<16x128xf32>
    %573 = arith.maximumf %570, %572 : vector<16x128xf32>
    %c11_313 = arith.constant 11 : index
    %c0_314 = arith.constant 0 : index
    %c0_315 = arith.constant 0 : index
    %574 = vector.load %arg3[%c11_313, %c0_314, %c0_315] : memref<15x16x128xf32, #tpu.memory_space<vmem>>, vector<1x16x128xf32>
    %575 = vector.shape_cast %574 : vector<1x16x128xf32> to vector<16x128xf32>
    %576 = arith.maximumf %573, %575 : vector<16x128xf32>
    %577 = vector.extract_strided_slice %576 {offsets = [0, 0], sizes = [15, 128], strides = [1, 1]} : vector<16x128xf32> to vector<15x128xf32>
    %578 = vector.extract_strided_slice %576 {offsets = [1, 0], sizes = [15, 128], strides = [1, 1]} : vector<16x128xf32> to vector<15x128xf32>
    %579 = arith.maximumf %577, %578 : vector<15x128xf32>
    %580 = vector.extract_strided_slice %579 {offsets = [0, 0], sizes = [13, 128], strides = [1, 1]} : vector<15x128xf32> to vector<13x128xf32>
    %581 = vector.extract_strided_slice %579 {offsets = [2, 0], sizes = [13, 128], strides = [1, 1]} : vector<15x128xf32> to vector<13x128xf32>
    %582 = arith.maximumf %580, %581 : vector<13x128xf32>
    %583 = vector.extract_strided_slice %582 {offsets = [0, 0], sizes = [12, 128], strides = [1, 1]} : vector<13x128xf32> to vector<12x128xf32>
    %584 = vector.extract_strided_slice %582 {offsets = [1, 0], sizes = [12, 128], strides = [1, 1]} : vector<13x128xf32> to vector<12x128xf32>
    %585 = arith.maximumf %583, %584 : vector<12x128xf32>
    %586 = arith.addf %568, %585 : vector<12x128xf32>
    %c10_316 = arith.constant 10 : index
    %c0_317 = arith.constant 0 : index
    %c0_318 = arith.constant 0 : index
    %587 = vector.load %arg3[%c10_316, %c0_317, %c0_318] : memref<15x16x128xf32, #tpu.memory_space<vmem>>, vector<1x16x128xf32>
    %588 = vector.shape_cast %587 : vector<1x16x128xf32> to vector<16x128xf32>
    %c12_319 = arith.constant 12 : index
    %c0_320 = arith.constant 0 : index
    %c0_321 = arith.constant 0 : index
    %589 = vector.load %arg3[%c12_319, %c0_320, %c0_321] : memref<15x16x128xf32, #tpu.memory_space<vmem>>, vector<1x16x128xf32>
    %590 = vector.shape_cast %589 : vector<1x16x128xf32> to vector<16x128xf32>
    %591 = arith.maximumf %588, %590 : vector<16x128xf32>
    %c13_322 = arith.constant 13 : index
    %c0_323 = arith.constant 0 : index
    %c0_324 = arith.constant 0 : index
    %592 = vector.load %arg3[%c13_322, %c0_323, %c0_324] : memref<15x16x128xf32, #tpu.memory_space<vmem>>, vector<1x16x128xf32>
    %593 = vector.shape_cast %592 : vector<1x16x128xf32> to vector<16x128xf32>
    %594 = arith.maximumf %591, %593 : vector<16x128xf32>
    %595 = vector.extract_strided_slice %594 {offsets = [0, 0], sizes = [15, 128], strides = [1, 1]} : vector<16x128xf32> to vector<15x128xf32>
    %596 = vector.extract_strided_slice %594 {offsets = [1, 0], sizes = [15, 128], strides = [1, 1]} : vector<16x128xf32> to vector<15x128xf32>
    %597 = arith.maximumf %595, %596 : vector<15x128xf32>
    %598 = vector.extract_strided_slice %597 {offsets = [0, 0], sizes = [13, 128], strides = [1, 1]} : vector<15x128xf32> to vector<13x128xf32>
    %599 = vector.extract_strided_slice %597 {offsets = [2, 0], sizes = [13, 128], strides = [1, 1]} : vector<15x128xf32> to vector<13x128xf32>
    %600 = arith.maximumf %598, %599 : vector<13x128xf32>
    %601 = vector.extract_strided_slice %600 {offsets = [0, 0], sizes = [12, 128], strides = [1, 1]} : vector<13x128xf32> to vector<12x128xf32>
    %602 = vector.extract_strided_slice %600 {offsets = [1, 0], sizes = [12, 128], strides = [1, 1]} : vector<13x128xf32> to vector<12x128xf32>
    %603 = arith.maximumf %601, %602 : vector<12x128xf32>
    %604 = arith.addf %586, %603 : vector<12x128xf32>
    %605 = tpu.iota {dimensions = array<i32: 0>} : vector<12x128xi32>
    %c2_i32_325 = arith.constant 2 : i32
    %c0_i32_326 = arith.constant 0 : i32
    %606 = arith.cmpi eq, %c2_i32_325, %c0_i32_326 : i32
    %c1_i32_327 = arith.constant 1 : i32
    %607 = arith.select %606, %c1_i32_327, %c2_i32_325 : i32
    %608 = vector.broadcast %607 : i32 to vector<12x128xi32>
    %609 = arith.remsi %605, %608 : vector<12x128xi32>
    %c0_i32_328 = arith.constant 0 : i32
    %610 = vector.broadcast %c0_i32_328 : i32 to vector<12x128xi32>
    %611 = arith.cmpi ne, %609, %610 : vector<12x128xi32>
    %c0_i32_329 = arith.constant 0 : i32
    %612 = vector.broadcast %c0_i32_329 : i32 to vector<12x128xi32>
    %613 = arith.cmpi slt, %609, %612 : vector<12x128xi32>
    %c0_i32_330 = arith.constant 0 : i32
    %614 = arith.cmpi slt, %607, %c0_i32_330 : i32
    %615 = vector.broadcast %614 : i1 to vector<12x128xi1>
    %616 = vector.broadcast %615 : vector<12x128xi1> to vector<12x128xi1>
    %617 = arith.xori %613, %616 : vector<12x128xi1>
    %618 = arith.andi %617, %611 : vector<12x128xi1>
    %619 = vector.broadcast %607 : i32 to vector<12x128xi32>
    %620 = arith.addi %609, %619 : vector<12x128xi32>
    %621 = arith.select %618, %620, %609 : vector<12x128xi1>, vector<12x128xi32>
    %c0_i32_331 = arith.constant 0 : i32
    %622 = vector.broadcast %c0_i32_331 : i32 to vector<12x128xi32>
    %623 = arith.cmpi eq, %621, %622 : vector<12x128xi32>
    %cst_332 = arith.constant 0.000000e+00 : f32
    %624 = vector.broadcast %cst_332 : f32 to vector<12x128xf32>
    %625 = arith.select %623, %604, %624 : vector<12x128xi1>, vector<12x128xf32>
    %cst_333 = arith.constant dense<0.000000e+00> : vector<128xf32>
    %626 = vector.multi_reduction <add>, %625, %cst_333 [0] : vector<12x128xf32> to vector<128xf32>
    %627 = vector.shape_cast %626 : vector<128xf32> to vector<1x128xf32>
    %cst_334 = arith.constant 0.000000e+00 : f32
    %628 = vector.broadcast %cst_334 : f32 to vector<1x128xf32>
    %629 = arith.maximumf %627, %628 : vector<1x128xf32>
    %cst_335 = arith.constant 1.000000e+00 : f32
    %630 = vector.broadcast %cst_335 : f32 to vector<1x128xf32>
    %631 = arith.addf %629, %630 : vector<1x128xf32>
    %632 = math.log %631 : vector<1x128xf32>
    %cst_336 = arith.constant 2.000000e+00 : f32
    %633 = math.log %cst_336 : f32
    %634 = vector.broadcast %633 : f32 to vector<1x128xf32>
    %635 = arith.divf %632, %634 : vector<1x128xf32>
    %cst_337 = arith.constant -0.42355749 : f32
    %636 = vector.broadcast %cst_337 : f32 to vector<1x128xf32>
    %637 = arith.mulf %635, %636 : vector<1x128xf32>
    %638 = arith.addf %495, %637 : vector<1x128xf32>
    %cst_338 = arith.constant 0.000000e+00 : f32
    %639 = vector.broadcast %cst_338 : f32 to vector<11x128xf32>
    %c0_339 = arith.constant 0 : index
    %c0_340 = arith.constant 0 : index
    %c0_341 = arith.constant 0 : index
    %640 = vector.load %arg3[%c0_339, %c0_340, %c0_341] : memref<15x16x128xf32, #tpu.memory_space<vmem>>, vector<1x16x128xf32>
    %641 = vector.shape_cast %640 : vector<1x16x128xf32> to vector<16x128xf32>
    %c2_342 = arith.constant 2 : index
    %c0_343 = arith.constant 0 : index
    %c0_344 = arith.constant 0 : index
    %642 = vector.load %arg3[%c2_342, %c0_343, %c0_344] : memref<15x16x128xf32, #tpu.memory_space<vmem>>, vector<1x16x128xf32>
    %643 = vector.shape_cast %642 : vector<1x16x128xf32> to vector<16x128xf32>
    %644 = arith.maximumf %641, %643 : vector<16x128xf32>
    %c4_345 = arith.constant 4 : index
    %c0_346 = arith.constant 0 : index
    %c0_347 = arith.constant 0 : index
    %645 = vector.load %arg3[%c4_345, %c0_346, %c0_347] : memref<15x16x128xf32, #tpu.memory_space<vmem>>, vector<1x16x128xf32>
    %646 = vector.shape_cast %645 : vector<1x16x128xf32> to vector<16x128xf32>
    %647 = arith.maximumf %644, %646 : vector<16x128xf32>
    %648 = vector.extract_strided_slice %647 {offsets = [0, 0], sizes = [15, 128], strides = [1, 1]} : vector<16x128xf32> to vector<15x128xf32>
    %649 = vector.extract_strided_slice %647 {offsets = [1, 0], sizes = [15, 128], strides = [1, 1]} : vector<16x128xf32> to vector<15x128xf32>
    %650 = arith.maximumf %648, %649 : vector<15x128xf32>
    %651 = vector.extract_strided_slice %650 {offsets = [0, 0], sizes = [13, 128], strides = [1, 1]} : vector<15x128xf32> to vector<13x128xf32>
    %652 = vector.extract_strided_slice %650 {offsets = [2, 0], sizes = [13, 128], strides = [1, 1]} : vector<15x128xf32> to vector<13x128xf32>
    %653 = arith.maximumf %651, %652 : vector<13x128xf32>
    %654 = vector.extract_strided_slice %653 {offsets = [0, 0], sizes = [11, 128], strides = [1, 1]} : vector<13x128xf32> to vector<11x128xf32>
    %655 = vector.extract_strided_slice %653 {offsets = [2, 0], sizes = [11, 128], strides = [1, 1]} : vector<13x128xf32> to vector<11x128xf32>
    %656 = arith.maximumf %654, %655 : vector<11x128xf32>
    %657 = arith.addf %639, %656 : vector<11x128xf32>
    %c3_348 = arith.constant 3 : index
    %c0_349 = arith.constant 0 : index
    %c0_350 = arith.constant 0 : index
    %658 = vector.load %arg3[%c3_348, %c0_349, %c0_350] : memref<15x16x128xf32, #tpu.memory_space<vmem>>, vector<1x16x128xf32>
    %659 = vector.shape_cast %658 : vector<1x16x128xf32> to vector<16x128xf32>
    %c5_351 = arith.constant 5 : index
    %c0_352 = arith.constant 0 : index
    %c0_353 = arith.constant 0 : index
    %660 = vector.load %arg3[%c5_351, %c0_352, %c0_353] : memref<15x16x128xf32, #tpu.memory_space<vmem>>, vector<1x16x128xf32>
    %661 = vector.shape_cast %660 : vector<1x16x128xf32> to vector<16x128xf32>
    %662 = arith.maximumf %659, %661 : vector<16x128xf32>
    %c7_354 = arith.constant 7 : index
    %c0_355 = arith.constant 0 : index
    %c0_356 = arith.constant 0 : index
    %663 = vector.load %arg3[%c7_354, %c0_355, %c0_356] : memref<15x16x128xf32, #tpu.memory_space<vmem>>, vector<1x16x128xf32>
    %664 = vector.shape_cast %663 : vector<1x16x128xf32> to vector<16x128xf32>
    %665 = arith.maximumf %662, %664 : vector<16x128xf32>
    %666 = vector.extract_strided_slice %665 {offsets = [0, 0], sizes = [15, 128], strides = [1, 1]} : vector<16x128xf32> to vector<15x128xf32>
    %667 = vector.extract_strided_slice %665 {offsets = [1, 0], sizes = [15, 128], strides = [1, 1]} : vector<16x128xf32> to vector<15x128xf32>
    %668 = arith.maximumf %666, %667 : vector<15x128xf32>
    %669 = vector.extract_strided_slice %668 {offsets = [0, 0], sizes = [13, 128], strides = [1, 1]} : vector<15x128xf32> to vector<13x128xf32>
    %670 = vector.extract_strided_slice %668 {offsets = [2, 0], sizes = [13, 128], strides = [1, 1]} : vector<15x128xf32> to vector<13x128xf32>
    %671 = arith.maximumf %669, %670 : vector<13x128xf32>
    %672 = vector.extract_strided_slice %671 {offsets = [0, 0], sizes = [11, 128], strides = [1, 1]} : vector<13x128xf32> to vector<11x128xf32>
    %673 = vector.extract_strided_slice %671 {offsets = [2, 0], sizes = [11, 128], strides = [1, 1]} : vector<13x128xf32> to vector<11x128xf32>
    %674 = arith.maximumf %672, %673 : vector<11x128xf32>
    %675 = arith.addf %657, %674 : vector<11x128xf32>
    %c6_357 = arith.constant 6 : index
    %c0_358 = arith.constant 0 : index
    %c0_359 = arith.constant 0 : index
    %676 = vector.load %arg3[%c6_357, %c0_358, %c0_359] : memref<15x16x128xf32, #tpu.memory_space<vmem>>, vector<1x16x128xf32>
    %677 = vector.shape_cast %676 : vector<1x16x128xf32> to vector<16x128xf32>
    %c8_360 = arith.constant 8 : index
    %c0_361 = arith.constant 0 : index
    %c0_362 = arith.constant 0 : index
    %678 = vector.load %arg3[%c8_360, %c0_361, %c0_362] : memref<15x16x128xf32, #tpu.memory_space<vmem>>, vector<1x16x128xf32>
    %679 = vector.shape_cast %678 : vector<1x16x128xf32> to vector<16x128xf32>
    %680 = arith.maximumf %677, %679 : vector<16x128xf32>
    %c10_363 = arith.constant 10 : index
    %c0_364 = arith.constant 0 : index
    %c0_365 = arith.constant 0 : index
    %681 = vector.load %arg3[%c10_363, %c0_364, %c0_365] : memref<15x16x128xf32, #tpu.memory_space<vmem>>, vector<1x16x128xf32>
    %682 = vector.shape_cast %681 : vector<1x16x128xf32> to vector<16x128xf32>
    %683 = arith.maximumf %680, %682 : vector<16x128xf32>
    %684 = vector.extract_strided_slice %683 {offsets = [0, 0], sizes = [15, 128], strides = [1, 1]} : vector<16x128xf32> to vector<15x128xf32>
    %685 = vector.extract_strided_slice %683 {offsets = [1, 0], sizes = [15, 128], strides = [1, 1]} : vector<16x128xf32> to vector<15x128xf32>
    %686 = arith.maximumf %684, %685 : vector<15x128xf32>
    %687 = vector.extract_strided_slice %686 {offsets = [0, 0], sizes = [13, 128], strides = [1, 1]} : vector<15x128xf32> to vector<13x128xf32>
    %688 = vector.extract_strided_slice %686 {offsets = [2, 0], sizes = [13, 128], strides = [1, 1]} : vector<15x128xf32> to vector<13x128xf32>
    %689 = arith.maximumf %687, %688 : vector<13x128xf32>
    %690 = vector.extract_strided_slice %689 {offsets = [0, 0], sizes = [11, 128], strides = [1, 1]} : vector<13x128xf32> to vector<11x128xf32>
    %691 = vector.extract_strided_slice %689 {offsets = [2, 0], sizes = [11, 128], strides = [1, 1]} : vector<13x128xf32> to vector<11x128xf32>
    %692 = arith.maximumf %690, %691 : vector<11x128xf32>
    %693 = arith.addf %675, %692 : vector<11x128xf32>
    %c9_366 = arith.constant 9 : index
    %c0_367 = arith.constant 0 : index
    %c0_368 = arith.constant 0 : index
    %694 = vector.load %arg3[%c9_366, %c0_367, %c0_368] : memref<15x16x128xf32, #tpu.memory_space<vmem>>, vector<1x16x128xf32>
    %695 = vector.shape_cast %694 : vector<1x16x128xf32> to vector<16x128xf32>
    %c11_369 = arith.constant 11 : index
    %c0_370 = arith.constant 0 : index
    %c0_371 = arith.constant 0 : index
    %696 = vector.load %arg3[%c11_369, %c0_370, %c0_371] : memref<15x16x128xf32, #tpu.memory_space<vmem>>, vector<1x16x128xf32>
    %697 = vector.shape_cast %696 : vector<1x16x128xf32> to vector<16x128xf32>
    %698 = arith.maximumf %695, %697 : vector<16x128xf32>
    %c13_372 = arith.constant 13 : index
    %c0_373 = arith.constant 0 : index
    %c0_374 = arith.constant 0 : index
    %699 = vector.load %arg3[%c13_372, %c0_373, %c0_374] : memref<15x16x128xf32, #tpu.memory_space<vmem>>, vector<1x16x128xf32>
    %700 = vector.shape_cast %699 : vector<1x16x128xf32> to vector<16x128xf32>
    %701 = arith.maximumf %698, %700 : vector<16x128xf32>
    %702 = vector.extract_strided_slice %701 {offsets = [0, 0], sizes = [15, 128], strides = [1, 1]} : vector<16x128xf32> to vector<15x128xf32>
    %703 = vector.extract_strided_slice %701 {offsets = [1, 0], sizes = [15, 128], strides = [1, 1]} : vector<16x128xf32> to vector<15x128xf32>
    %704 = arith.maximumf %702, %703 : vector<15x128xf32>
    %705 = vector.extract_strided_slice %704 {offsets = [0, 0], sizes = [13, 128], strides = [1, 1]} : vector<15x128xf32> to vector<13x128xf32>
    %706 = vector.extract_strided_slice %704 {offsets = [2, 0], sizes = [13, 128], strides = [1, 1]} : vector<15x128xf32> to vector<13x128xf32>
    %707 = arith.maximumf %705, %706 : vector<13x128xf32>
    %708 = vector.extract_strided_slice %707 {offsets = [0, 0], sizes = [11, 128], strides = [1, 1]} : vector<13x128xf32> to vector<11x128xf32>
    %709 = vector.extract_strided_slice %707 {offsets = [2, 0], sizes = [11, 128], strides = [1, 1]} : vector<13x128xf32> to vector<11x128xf32>
    %710 = arith.maximumf %708, %709 : vector<11x128xf32>
    %711 = arith.addf %693, %710 : vector<11x128xf32>
    %712 = tpu.iota {dimensions = array<i32: 0>} : vector<11x128xi32>
    %c3_i32 = arith.constant 3 : i32
    %c0_i32_375 = arith.constant 0 : i32
    %713 = arith.cmpi eq, %c3_i32, %c0_i32_375 : i32
    %c1_i32_376 = arith.constant 1 : i32
    %714 = arith.select %713, %c1_i32_376, %c3_i32 : i32
    %715 = vector.broadcast %714 : i32 to vector<11x128xi32>
    %716 = arith.remsi %712, %715 : vector<11x128xi32>
    %c0_i32_377 = arith.constant 0 : i32
    %717 = vector.broadcast %c0_i32_377 : i32 to vector<11x128xi32>
    %718 = arith.cmpi ne, %716, %717 : vector<11x128xi32>
    %c0_i32_378 = arith.constant 0 : i32
    %719 = vector.broadcast %c0_i32_378 : i32 to vector<11x128xi32>
    %720 = arith.cmpi slt, %716, %719 : vector<11x128xi32>
    %c0_i32_379 = arith.constant 0 : i32
    %721 = arith.cmpi slt, %714, %c0_i32_379 : i32
    %722 = vector.broadcast %721 : i1 to vector<11x128xi1>
    %723 = vector.broadcast %722 : vector<11x128xi1> to vector<11x128xi1>
    %724 = arith.xori %720, %723 : vector<11x128xi1>
    %725 = arith.andi %724, %718 : vector<11x128xi1>
    %726 = vector.broadcast %714 : i32 to vector<11x128xi32>
    %727 = arith.addi %716, %726 : vector<11x128xi32>
    %728 = arith.select %725, %727, %716 : vector<11x128xi1>, vector<11x128xi32>
    %c0_i32_380 = arith.constant 0 : i32
    %729 = vector.broadcast %c0_i32_380 : i32 to vector<11x128xi32>
    %730 = arith.cmpi eq, %728, %729 : vector<11x128xi32>
    %cst_381 = arith.constant 0.000000e+00 : f32
    %731 = vector.broadcast %cst_381 : f32 to vector<11x128xf32>
    %732 = arith.select %730, %711, %731 : vector<11x128xi1>, vector<11x128xf32>
    %cst_382 = arith.constant dense<0.000000e+00> : vector<128xf32>
    %733 = vector.multi_reduction <add>, %732, %cst_382 [0] : vector<11x128xf32> to vector<128xf32>
    %734 = vector.shape_cast %733 : vector<128xf32> to vector<1x128xf32>
    %cst_383 = arith.constant 0.000000e+00 : f32
    %735 = vector.broadcast %cst_383 : f32 to vector<1x128xf32>
    %736 = arith.maximumf %734, %735 : vector<1x128xf32>
    %cst_384 = arith.constant 1.000000e+00 : f32
    %737 = vector.broadcast %cst_384 : f32 to vector<1x128xf32>
    %738 = arith.addf %736, %737 : vector<1x128xf32>
    %739 = math.log %738 : vector<1x128xf32>
    %cst_385 = arith.constant 2.000000e+00 : f32
    %740 = math.log %cst_385 : f32
    %741 = vector.broadcast %740 : f32 to vector<1x128xf32>
    %742 = arith.divf %739, %741 : vector<1x128xf32>
    %cst_386 = arith.constant -0.686591864 : f32
    %743 = vector.broadcast %cst_386 : f32 to vector<1x128xf32>
    %744 = arith.mulf %742, %743 : vector<1x128xf32>
    %745 = arith.addf %638, %744 : vector<1x128xf32>
    %cst_387 = arith.constant 0.638393402 : f32
    %746 = vector.broadcast %cst_387 : f32 to vector<1x128xf32>
    %747 = arith.mulf %745, %746 : vector<1x128xf32>
    %c0_388 = arith.constant 0 : index
    %c0_389 = arith.constant 0 : index
    %748 = vector.load %arg2[%c0_388, %c0_389] : memref<1x128xf32, #tpu.memory_space<vmem>>, vector<1x128xf32>
    tpu.vector_store %arg2[%c0_388, %c0_389], %747 {strides = array<i32>} : memref<1x128xf32, #tpu.memory_space<vmem>>, vector<1x128xf32>,
    return
  }
  func.func @transform_0(%arg0: i32) -> (i32, i32, i32) {
    %c0_i32 = arith.constant 0 : i32
    %c0_i32_0 = arith.constant 0 : i32
    %c0_i32_1 = arith.constant 0 : i32
    return %c0_i32, %c0_i32_0, %arg0 : i32, i32, i32
  }
  func.func @transform_1(%arg0: i32) -> (i32, i32) {
    %c0_i32 = arith.constant 0 : i32
    %c0_i32_0 = arith.constant 0 : i32
    return %c0_i32, %arg0 : i32, i32
  }
}

</mosaic_0001>

<bundles_post_ra>
// kernel: tpu_custom_call.1
= control target key start
LH: loop header
LB: loop body
LE: loop exit
PB: predicated region body
PF: predicated region fallthrough
CT: control target
= control target key end

     0   :  { %6 = vsyncpa [#allocation4], 0  ;;  %s1878_s0 = inlined_call_operand.hbm [shape: f32[16,16,128], index: 0, kind: input, shape index: {}]   ;;  %s1879_s1 = inlined_call_operand.hbm [shape: f32[1,128], index: 1, kind: output, shape index: {}]  }
   0x1   :  { %7 = vsyncpa [#allocation5], 0  ;;  %s1343_s6 = smov [#allocation3]  }
   0x2   :  { %s13_s7 = sshll.u32 %s1343_s6, 4  ;;  %s14_s7 = int_to_ptr.vmem [resolvable:$true] %s13_s7 }
   0x3   :  { %s1307_s8 = scalar_lea.vmem %s14_s7, 4096  ;;  %p1312_p1 = scmp.lt.s32.totalorder %s14_s7, %s14_s7 }
   0x4   :  { %p1308_p0 = scmp.ne.s32.totalorder %s14_s7, %s1307_s8  ;;  %p1313_p2 = scmp.lt.s32.totalorder %s1307_s8, %s1307_s8 }
   0x6   :  { %p1314_p3 = por %p1313_p2, %p1312_p1 }
   0x8   :  { %p1315_p4 = pnand %p1314_p3, %p1308_p0 }
   0xa   :  { %1318 = shalt.err (!%p1315_p4)
}
   0xb   :  { %s1344_s9 = smov 128   ;;  %s1345_s10 = smov 8  }
   0xc   :  { %19 = dma.hbm_to_vmem [thread:$0]  %s1878_s0, 4096, %s14_s7, [#allocation4], %s1344_s9, %s1344_s9, %s1345_s10  }
   0xd   :  { %1339 = dma.done.wait [#allocation4], 4096  }
   0xe   :  { %1340 = vsyncadd [#allocation4], 4294963200  ;;  %v23_v0 = vld [vmem:[#allocation3] sm:$0xff]  ;;  %v24_v1 = vld [vmem:[#allocation3 + $0x8] sm:$0xff]  ;;  %vm148_vm0 = vcmask 1046528   ;;  %v833_v63 = vlaneseq  ;;  %vm663_vm1 = vcmask 1045504  }
   0xf   :  { %v26_v2 = vld [vmem:[#allocation3 + $0x10] sm:$0xff]  ;;  %v27_v3 = vld [vmem:[#allocation3 + $0x18] sm:$0xff]  ;;  %v33_v6 = vld [vmem:[#allocation3 + $0x20] sm:$0xff]  ;;  %vm864_vm2 = vcmask 1044480   ;;  %vm1068_vm5 = vcmask 1043456   ;;  %vm1248_vm12 = vcmask 1042432  }
  0x10   :  { %v1360_v4 = vmax.f32 %v23_v0, %v26_v2  ;;  %v1362_v5 = vmax.f32 %v24_v1, %v27_v3  ;;  %v34_v8 = vld [vmem:[#allocation3 + $0x28] sm:$0xff]  ;;  %v41_v9 = vld [vmem:[#allocation3 + $0x30] sm:$0xff]  ;;  %v1366_v11 = vmax.f32 %v26_v2, %v33_v6  ;;  %v42_v12 = vld [vmem:[#allocation3 + $0x38] sm:$0xff]  ;;  %s1346_s0 = smov [#allocation6]  }
  0x11   :  { %v49_v13 = vld [vmem:[#allocation3 + $0x40] sm:$0xff]  ;;  %v50_v14 = vld [vmem:[#allocation3 + $0x48] sm:$0xff]  ;;  %v57_v15 = vld [vmem:[#allocation3 + $0x50] sm:$0xff]  ;;  %v1368_v17 = vmax.f32 %v27_v3, %v34_v8  ;;  %v1372_v22 = vmax.f32 %v33_v6, %v41_v9  ;;  %v1374_v23 = vmax.f32 %v34_v8, %v42_v12  ;;  %s1272_s13 = sshll.u32 %s1346_s0, 4  ;;  %s1273_s13 = int_to_ptr.vmem [resolvable:$true] %s1272_s13 }
  0x12   :  { %1895 = vst [vmem:[#allocation9_spill] sm:$0xff] %v1362_v5  ;;  %v149_v7 = vrot.slane %v1360_v4, 1  ;;  %v150_v10 = vrot.slane %v1362_v5, 1  ;;  %v58_v16 = vld [vmem:[#allocation3 + $0x58] sm:$0xff]  ;;  %v65_v18 = vld [vmem:[#allocation3 + $0x60] sm:$0xff]  ;;  %v66_v19 = vld [vmem:[#allocation3 + $0x68] sm:$0xff]  ;;  %v1376_v24 = vmax.f32 %v41_v9, %v49_v13  ;;  %v1378_v25 = vmax.f32 %v42_v12, %v50_v14  ;;  %p1324_p6 = scmp.lt.s32.totalorder %s1273_s13, %s1273_s13 }
  0x13   :  { %v162_v21 = vrot.slane %v1366_v11, 1  ;;  %v73_v26 = vld [vmem:[#allocation3 + $0x70] sm:$0xff]  ;;  %v74_v27 = vld [vmem:[#allocation3 + $0x78] sm:$0xff]  ;;  %v1380_v28 = vmax.f32 %v49_v13, %v57_v15  ;;  %v1382_v29 = vmax.f32 %v50_v14, %v58_v16  ;;  %v163_v31 = vrot.slane %v1368_v17, 1  ;;  %v81_v52 = vld [vmem:[#allocation3 + $0x80] sm:$0xff]  ;;  %s1319_s14 = scalar_lea.vmem %s1273_s13, 16 }
  0x14   :  { %v151_v20 = vsel %vm148_vm0, %v149_v7, %v150_v10  ;;  %1896 = vst [vmem:[#allocation10_spill] sm:$0xff] %v1376_v24  ;;  %1897 = vst [vmem:[#allocation11_spill] sm:$0xff] %v1378_v25  ;;  %v155_v30 = vmax.f32 %v1362_v5, %v150_v10  ;;  %v1386_v32 = vmax.f32 %v57_v15, %v65_v18  ;;  %v175_v35 = vrot.slane %v1372_v22, 1  ;;  %v82_v57 = vld [vmem:[#allocation3 + $0x88] sm:$0xff]  ;;  %v89_v58 = vld [vmem:[#allocation3 + $0x90] sm:$0xff]  ;;  %p1320_p5 = scmp.ne.s32.totalorder %s1273_s13, %s1319_s14  ;;  %s1323_s15 = scalar_lea.vmem %s1273_s13, 32 }
  0x15   :  { %1898 = vst [vmem:[#allocation12_spill] sm:$0xff] %v1382_v29  ;;  %v1388_v33 = vmax.f32 %v58_v16, %v66_v19  ;;  %v154_v34 = vmax.f32 %v1360_v4, %v151_v20  ;;  %v1392_v36 = vmax.f32 %v65_v18, %v73_v26  ;;  %v1394_v37 = vmax.f32 %v66_v19, %v74_v27  ;;  %v90_v59 = vld [vmem:[#allocation3 + $0x98] sm:$0xff]  ;;  %v97_v0 = vld [vmem:[#allocation3 + $0xa0] sm:$0xff]  ;;  %v98_v8 = vld [vmem:[#allocation3 + $0xa8] sm:$0xff]  ;;  %p1325_p7 = scmp.lt.s32.totalorder %s1323_s15, %s1319_s14 }
  0x16   :  { %1899 = vst [vmem:[#allocation13_spill] sm:$0xff] %v1386_v32  ;;  %v164_v38 = vsel %vm148_vm0, %v162_v21, %v163_v31  ;;  %v168_v39 = vmax.f32 %v1368_v17, %v163_v31  ;;  %v176_v41 = vrot.slane %v1374_v23, 1  ;;  %v188_v42 = vrot.slane %v1376_v24, 1  ;;  %v105_v16 = vld [vmem:[#allocation3 + $0xb0] sm:$0xff]  ;;  %v106_v18 = vld [vmem:[#allocation3 + $0xb8] sm:$0xff] }
  0x17   :  { %1900 = vst [vmem:[#allocation14_spill] sm:$0xff] %v1388_v33  ;;  %1901 = vst [vmem:[#allocation15_spill] sm:$0xff] %v1392_v36  ;;  %v167_v40 = vmax.f32 %v1366_v11, %v164_v38  ;;  %v189_v43 = vrot.slane %v1378_v25, 1  ;;  %v201_v45 = vrot.slane %v1380_v28, 1  ;;  %v202_v46 = vrot.slane %v1382_v29, 1  ;;  %p1326_p8 = por %p1325_p7, %p1324_p6 }
  0x18   :  { %1902 = vst [vmem:[#allocation16_spill] sm:$0xff] %v1394_v37  ;;  %v170_v44 = vadd.f32 %v168_v39, %v155_v30  ;;  %v214_v47 = vrot.slane %v1386_v32, 1  ;;  %v177_v49 = vsel %vm148_vm0, %v175_v35, %v176_v41  ;;  %v181_v50 = vmax.f32 %v1374_v23, %v176_v41 }
  0x19   :  { %v169_v48 = vadd.f32 %v167_v40, %v154_v34  ;;  %v190_v51 = vsel %vm148_vm0, %v188_v42, %v189_v43  ;;  %v180_v53 = vmax.f32 %v1372_v22, %v177_v49  ;;  %v194_v55 = vmax.f32 %v1378_v25, %v189_v43  ;;  %v113_v42 = vld [vmem:[#allocation3 + $0xc0] sm:$0xff]  ;;  %v114_v43 = vld [vmem:[#allocation3 + $0xc8] sm:$0xff]  ;;  %v122_v49 = vld [vmem:[#allocation3 + $0xd8] sm:$0xff]  ;;  %p1327_p9 = pnand %p1326_p8, %p1320_p5 }
  0x1a   :  { %v193_v54 = vmax.f32 %v1376_v24, %v190_v51  ;;  %v203_v56 = vsel %vm148_vm0, %v201_v45, %v202_v46  ;;  %v183_v60 = vadd.f32 %v181_v50, %v170_v44  ;;  %v207_v61 = vmax.f32 %v1382_v29, %v202_v46  ;;  %v129_v50 = vld [vmem:[#allocation3 + $0xe0] sm:$0xff] }
  0x1b   :  { %v215_v62 = vrot.slane %v1388_v33, 1  ;;  %v182_v1 = vadd.f32 %v180_v53, %v169_v48  ;;  %v206_v2 = vmax.f32 %v1380_v28, %v203_v56  ;;  %v227_v3 = vrot.slane %v1392_v36, 1  ;;  %v121_v48 = vld [vmem:[#allocation3 + $0xd0] sm:$0xff] }
  0x1c   :  { %v228_v6 = vrot.slane %v1394_v37, 1  ;;  %v1417_v7 = vmax.f32 %v73_v26, %v81_v52  ;;  %v196_v9 = vadd.f32 %v194_v55, %v183_v60  ;;  %v1421_v13 = vmax.f32 %v74_v27, %v82_v57  ;;  %v137_v60 = vld [vmem:[#allocation3 + $0xf0] sm:$0xff] }
  0x1d   :  { %v216_v10 = vsel %vm148_vm0, %v214_v47, %v215_v62  ;;  %v220_v12 = vmax.f32 %v1388_v33, %v215_v62  ;;  %v1423_v14 = vmax.f32 %v81_v52, %v89_v58  ;;  %v1425_v15 = vmax.f32 %v82_v57, %v90_v59 }
  0x1e   :  { %v195_v19 = vadd.f32 %v193_v54, %v182_v1  ;;  %v1427_v20 = vmax.f32 %v89_v58, %v97_v0  ;;  %v209_v21 = vadd.f32 %v207_v61, %v196_v9  ;;  %v219_v26 = vmax.f32 %v1386_v32, %v216_v10  ;;  %v138_v61 = vld [vmem:[#allocation3 + $0xf8] sm:$0xff] }
  0x1f   :  { %v229_v30 = vsel %vm148_vm0, %v227_v3, %v228_v6  ;;  %v1431_v31 = vmax.f32 %v90_v59, %v98_v8  ;;  %v240_v27 = vrot.slane %v1417_v7, 1  ;;  %v241_v35 = vrot.slane %v1421_v13, 1  ;;  %v130_v59 = vld [vmem:[#allocation3 + $0xe8] sm:$0xff] }
  0x20   :  { %v208_v34 = vadd.f32 %v206_v2, %v195_v19  ;;  %v1435_v38 = vmax.f32 %v97_v0, %v105_v16  ;;  %v1437_v39 = vmax.f32 %v98_v8, %v106_v18  ;;  %v222_v40 = vadd.f32 %v220_v12, %v209_v21 }
  0x21   :  { %v233_v41 = vmax.f32 %v1394_v37, %v228_v6  ;;  %v232_v44 = vmax.f32 %v1392_v36, %v229_v30  ;;  %v253_v45 = vrot.slane %v1423_v14, 1  ;;  %v254_v46 = vrot.slane %v1425_v15, 1 }
  0x22   :  { %v266_v47 = vrot.slane %v1427_v20, 1  ;;  %v221_v51 = vadd.f32 %v219_v26, %v208_v34  ;;  %v267_v52 = vrot.slane %v1431_v31, 1  ;;  %v279_v53 = vrot.slane %v1435_v38, 1 }
  0x23   :  { %v280_v54 = vrot.slane %v1437_v39, 1  ;;  %v242_v55 = vsel %vm148_vm0, %v240_v27, %v241_v35  ;;  %v1448_v56 = vshrl.u32 %v833_v63, 7  ;;  %v1450_v57 = vmax.f32 %v105_v16, %v113_v42 }
  0x24   :  { %v1452_v58 = vmax.f32 %v106_v18, %v114_v43  ;;  %v235_v62 = vadd.f32 %v233_v41, %v222_v40  ;;  %v246_v0 = vmax.f32 %v1421_v13, %v241_v35  ;;  %v1455_v1 = vmax.f32 %v113_v42, %v121_v48 }
  0x25   :  { %v1457_v2 = vmax.f32 %v114_v43, %v122_v49  ;;  %v1459_v3 = vmax.f32 %v121_v48, %v129_v50  ;;  %v255_v6 = vsel %vm148_vm0, %v253_v45, %v254_v46  ;;  %v234_v63 = vadd.f32 %v232_v44, %v221_v51 }
  0x26   :  { %v245_v8 = vmax.f32 %v1417_v7, %v242_v55  ;;  %v1464_v9 = vsel %vm148_vm0, %v266_v47, %v267_v52  ;;  %v1467_v10 = vsel %vm148_vm0, %v279_v53, %v280_v54  ;;  %v1469_v12 = vmax.f32 %v122_v49, %v130_v59 }
  0x27   :  { %v1471_v16 = vmax.f32 %v129_v50, %v137_v60  ;;  %v1473_v18 = vmax.f32 %v130_v59, %v138_v61  ;;  %v259_v19 = vmax.f32 %v1425_v15, %v254_v46  ;;  %v248_v21 = vadd.f32 %v246_v0, %v235_v62 }
  0x28   :  { %v258_v26 = vmax.f32 %v1423_v14, %v255_v6  ;;  %v292_v30 = vrot.slane %v1450_v57, 1  ;;  %v293_v34 = vrot.slane %v1452_v58, 1  ;;  %v271_v27 = vmax.f32 %v1427_v20, %v1464_v9 }
  0x29   :  { %v272_v35 = vmax.f32 %v1431_v31, %v267_v52  ;;  %v1485_v41 = vmax.f32 %v1437_v39, %v280_v54  ;;  %v247_v42 = vadd.f32 %v245_v8, %v234_v63  ;;  %v355_v43 = vmax.f32 %v1360_v4, %v1366_v11 }
  0x2a   :  { %v356_v44 = vmax.f32 %v1362_v5, %v1368_v17  ;;  %v377_v45 = vmax.f32 %v1366_v11, %v1372_v22  ;;  %v305_v46 = vrot.slane %v1455_v1, 1  ;;  %v306_v47 = vrot.slane %v1457_v2, 1 }
  0x2b   :  { %v318_v48 = vrot.slane %v1459_v3, 1  ;;  %v378_v49 = vmax.f32 %v1368_v17, %v1374_v23  ;;  %v261_v50 = vadd.f32 %v259_v19, %v248_v21  ;;  %v1499_v51 = vsel %vm148_vm0, %v292_v30, %v293_v34 }
  0x2c   :  { %v359_v52 = vrot.slane %v355_v43, 1  ;;  %v360_v53 = vrot.slane %v356_v44, 1  ;;  %v1502_v54 = vmax.f32 %v1452_v58, %v293_v34  ;;  %v381_v55 = vrot.slane %v377_v45, 1 }
  0x2d   :  { %v382_v11 = vrot.slane %v378_v49, 1  ;;  %v399_v59 = vmax.f32 %v1372_v22, %v1376_v24  ;;  %v319_v60 = vrot.slane %v1469_v12, 1  ;;  %v400_v17 = vmax.f32 %v1374_v23, %v1378_v25 }
  0x2e   :  { %v361_v61 = vsel %vm148_vm0, %v359_v52, %v360_v53  ;;  %v365_v62 = vmax.f32 %v356_v44, %v360_v53  ;;  %v260_v0 = vadd.f32 %v258_v26, %v247_v42  ;;  %v1514_v34 = vsel %vm148_vm0, %v305_v46, %v306_v47 }
  0x2f   :  { %v364_v6 = vmax.f32 %v355_v43, %v361_v61  ;;  %v383_v63 = vsel %vm148_vm0, %v381_v55, %v382_v11  ;;  %v387_v8 = vmax.f32 %v378_v49, %v382_v11  ;;  %v403_v30 = vrot.slane %v399_v59, 1 }
  0x30   :  { %v369_v19 = vrot.slane %v365_v62, 1  ;;  %v386_v21 = vmax.f32 %v377_v45, %v383_v63  ;;  %v404_v44 = vrot.slane %v400_v17, 1  ;;  %v274_v53 = vadd.f32 %v272_v35, %v261_v50 }
  0x31   :  { %v368_v40 = vrot.slane %v364_v6, 1  ;;  %v391_v52 = vrot.slane %v387_v8, 1  ;;  %v1517_v5 = vmax.f32 %v1457_v2, %v306_v47  ;;  %v421_v42 = vmax.f32 %v1376_v24, %v1380_v28 }
  0x32   :  { %v390_v26 = vrot.slane %v386_v21, 1  ;;  %v374_v49 = vmax.f32 %v365_v62, %v369_v19  ;;  %v405_v45 = vsel %vm148_vm0, %v403_v30, %v404_v44  ;;  %v1527_v47 = vsel %vm148_vm0, %v318_v48, %v319_v60 }
  0x33   :  { %v370_v43 = vsel %vm148_vm0, %v368_v40, %v369_v19  ;;  %v396_v55 = vmax.f32 %v387_v8, %v391_v52  ;;  %v408_v35 = vmax.f32 %v399_v59, %v405_v45  ;;  %v1530_v50 = vmax.f32 %v1469_v12, %v319_v60 }
  0x34   :  { %v373_v11 = vmax.f32 %v364_v6, %v370_v43  ;;  %v392_v61 = vsel %vm148_vm0, %v390_v26, %v391_v52  ;;  %v409_v9 = vmax.f32 %v400_v17, %v404_v44  ;;  %v422_v62 = vmax.f32 %v1378_v25, %v1382_v29 }
  0x35   :  { %v395_v63 = vmax.f32 %v386_v21, %v392_v61  ;;  %v412_v40 = vrot.slane %v408_v35, 1  ;;  %v425_v8 = vrot.slane %v421_v42, 1  ;;  %v443_v19 = vmax.f32 %v1380_v28, %v1386_v32 }
  0x36   :  { %v273_v6 = vadd.f32 %v271_v27, %v260_v0  ;;  %v398_v30 = vadd.f32 %v396_v55, %v374_v49  ;;  %v413_v52 = vrot.slane %v409_v9, 1  ;;  %v444_v48 = vmax.f32 %v1382_v29, %v1388_v33 }
  0x37   :  { %v397_v59 = vadd.f32 %v395_v63, %v373_v11  ;;  %v426_v26 = vrot.slane %v422_v62, 1  ;;  %v447_v60 = vrot.slane %v443_v19, 1  ;;  %v465_v17 = vmax.f32 %v1386_v32, %v1392_v36 }
  0x38   :  { %v414_v21 = vsel %vm148_vm0, %v412_v40, %v413_v52  ;;  %v418_v44 = vmax.f32 %v409_v9, %v413_v52  ;;  %v448_v43 = vrot.slane %v444_v48, 1  ;;  %v466_v45 = vmax.f32 %v1388_v33, %v1394_v37 }
  0x39   :  { %v417_v0 = vmax.f32 %v408_v35, %v414_v21  ;;  %v427_v49 = vsel %vm148_vm0, %v425_v8, %v426_v26  ;;  %v431_v55 = vmax.f32 %v422_v62, %v426_v26  ;;  %v331_v11 = vrot.slane %v1471_v16, 1 }
  0x3a   :  { %v430_v61 = vmax.f32 %v421_v42, %v427_v49  ;;  %v449_v63 = vsel %vm148_vm0, %v447_v60, %v448_v43  ;;  %v469_v46 = vrot.slane %v465_v17, 1  ;;  %v420_v32 = vadd.f32 %v418_v44, %v398_v30 }
  0x3b   :  { %v435_v40 = vrot.slane %v431_v55, 1  ;;  %v452_v9 = vmax.f32 %v443_v19, %v449_v63  ;;  %v453_v52 = vmax.f32 %v444_v48, %v448_v43  ;;  %v419_v25 = vadd.f32 %v417_v0, %v397_v59 }
  0x3c   :  { %v434_v24 = vrot.slane %v430_v61, 1  ;;  %v470_v33 = vrot.slane %v466_v45, 1  ;;  %v487_v27 = vmax.f32 %v1392_v36, %v1417_v7  ;;  %v488_v62 = vmax.f32 %v1394_v37, %v1421_v13 }
  0x3d   :  { %v440_v35 = vmax.f32 %v431_v55, %v435_v40  ;;  %v456_v21 = vrot.slane %v452_v9, 1  ;;  %v457_v8 = vrot.slane %v453_v52, 1  ;;  %v332_v42 = vrot.slane %v1473_v18, 1 }
  0x3e   :  { %v436_v26 = vsel %vm148_vm0, %v434_v24, %v435_v40  ;;  %v471_v30 = vsel %vm148_vm0, %v469_v46, %v470_v33  ;;  %v475_v19 = vmax.f32 %v466_v45, %v470_v33  ;;  %v287_v43 = vadd.f32 %v1485_v41, %v274_v53 }
  0x3f   :  { %v439_v48 = vmax.f32 %v430_v61, %v436_v26  ;;  %v442_v59 = vadd.f32 %v440_v35, %v420_v32  ;;  %v458_v60 = vsel %vm148_vm0, %v456_v21, %v457_v8  ;;  %v462_v44 = vmax.f32 %v453_v52, %v457_v8 }
  0x40   :  { %v461_v0 = vmax.f32 %v452_v9, %v458_v60  ;;  %v474_v49 = vmax.f32 %v465_v17, %v471_v30  ;;  %v479_v55 = vrot.slane %v475_v19, 1  ;;  %v491_v37 = vrot.slane %v487_v27, 1 }
  0x41   :  { %v441_v63 = vadd.f32 %v439_v48, %v419_v25  ;;  %v464_v36 = vadd.f32 %v462_v44, %v442_v59  ;;  %v492_v29 = vrot.slane %v488_v62, 1  ;;  %v1903_v24 = vmax.f32 %v1435_v38, %v1467_v10 }
  0x42   :  { %v478_v46 = vrot.slane %v474_v49, 1  ;;  %v484_v33 = vmax.f32 %v475_v19, %v479_v55  ;;  %v509_v32 = vmax.f32 %v1417_v7, %v1423_v14  ;;  %v510_v53 = vmax.f32 %v1421_v13, %v1425_v15 }
  0x43   :  { %v286_v40 = vadd.f32 %v1903_v24, %v273_v6  ;;  %v463_v45 = vadd.f32 %v461_v0, %v441_v63  ;;  %v493_v61 = vsel %vm148_vm0, %v491_v37, %v492_v29  ;;  %v497_v41 = vmax.f32 %v488_v62, %v492_v29 }
  0x44   :  { %v1568_v25 = vsel %vm148_vm0, %v331_v11, %v332_v42  ;;  %v480_v10 = vsel %vm148_vm0, %v478_v46, %v479_v55  ;;  %v486_v6 = vadd.f32 %v484_v33, %v464_v36  ;;  %v496_v17 = vmax.f32 %v487_v27, %v493_v61 }
  0x45   :  { %v483_v9 = vmax.f32 %v474_v49, %v480_v10  ;;  %v501_v52 = vrot.slane %v497_v41, 1  ;;  %v513_v35 = vrot.slane %v509_v32, 1  ;;  %v514_v21 = vrot.slane %v510_v53, 1 }
  0x46   :  { %v300_v8 = vadd.f32 %v1502_v54, %v287_v43  ;;  %v500_v37 = vrot.slane %v496_v17, 1  ;;  %v531_v29 = vmax.f32 %v1423_v14, %v1427_v20  ;;  %v532_v62 = vmax.f32 %v1425_v15, %v1431_v31 }
  0x47   :  { %v485_v26 = vadd.f32 %v483_v9, %v463_v45  ;;  %v506_v11 = vmax.f32 %v497_v41, %v501_v52  ;;  %v515_v30 = vsel %vm148_vm0, %v513_v35, %v514_v21  ;;  %v519_v19 = vmax.f32 %v510_v53, %v514_v21 }
  0x48   :  { %v502_v36 = vsel %vm148_vm0, %v500_v37, %v501_v52  ;;  %v518_v27 = vmax.f32 %v509_v32, %v515_v30  ;;  %v535_v48 = vrot.slane %v531_v29, 1  ;;  %v536_v59 = vrot.slane %v532_v62, 1 }
  0x49   :  { %v505_v60 = vmax.f32 %v496_v17, %v502_v36  ;;  %v508_v44 = vadd.f32 %v506_v11, %v486_v6  ;;  %v523_v54 = vrot.slane %v519_v19, 1  ;;  %v553_v43 = vmax.f32 %v1427_v20, %v1435_v38 }
  0x4a   :  { %v522_v0 = vrot.slane %v518_v27, 1  ;;  %v537_v49 = vsel %vm148_vm0, %v535_v48, %v536_v59  ;;  %v541_v55 = vmax.f32 %v532_v62, %v536_v59  ;;  %v554_v63 = vmax.f32 %v1431_v31, %v1437_v39 }
  0x4b   :  { %v507_v24 = vadd.f32 %v505_v60, %v485_v26  ;;  %v528_v46 = vmax.f32 %v519_v19, %v523_v54  ;;  %v540_v33 = vmax.f32 %v531_v29, %v537_v49  ;;  %v557_v45 = vrot.slane %v553_v43, 1 }
  0x4c   :  { %v524_v32 = vsel %vm148_vm0, %v522_v0, %v523_v54  ;;  %v545_v61 = vrot.slane %v541_v55, 1  ;;  %v558_v41 = vrot.slane %v554_v63, 1  ;;  %v575_v53 = vmax.f32 %v1435_v38, %v1450_v57 }
  0x4d   :  { %v1904_v10 = vmax.f32 %v1450_v57, %v1499_v51  ;;  %v527_v17 = vmax.f32 %v518_v27, %v524_v32  ;;  %v544_v9 = vrot.slane %v540_v33, 1  ;;  %v576_v52 = vmax.f32 %v1437_v39, %v1452_v58 }
  0x4e   :  { %v530_v35 = vadd.f32 %v528_v46, %v508_v44  ;;  %v559_v21 = vsel %vm148_vm0, %v557_v45, %v558_v41  ;;  %v563_v37 = vmax.f32 %v554_v63, %v558_v41  ;;  %v579_v29 = vrot.slane %v575_v53, 1 }
  0x4f   :  { %v299_v6 = vadd.f32 %v1904_v10, %v286_v40  ;;  %v546_v62 = vsel %vm148_vm0, %v544_v9, %v545_v61  ;;  %v550_v26 = vmax.f32 %v541_v55, %v545_v61  ;;  %v562_v11 = vmax.f32 %v553_v43, %v559_v21 }
  0x50   :  { %v580_v30 = vrot.slane %v576_v52, 1  ;;  %v529_v19 = vadd.f32 %v527_v17, %v507_v24  ;;  %v549_v36 = vmax.f32 %v540_v33, %v546_v62  ;;  %v567_v48 = vrot.slane %v563_v37, 1 }
  0x51   :  { %v597_v51 = vmax.f32 %v1450_v57, %v1455_v1  ;;  %v566_v40 = vrot.slane %v562_v11, 1  ;;  %v598_v60 = vmax.f32 %v1452_v58, %v1457_v2  ;;  %v1905_v44 = vmax.f32 %v1455_v1, %v1514_v34 }
  0x52   :  { %v581_v27 = vsel %vm148_vm0, %v579_v29, %v580_v30  ;;  %v585_v59 = vmax.f32 %v576_v52, %v580_v30  ;;  %v313_v43 = vadd.f32 %v1517_v5, %v300_v8  ;;  %v619_v46 = vmax.f32 %v1455_v1, %v1459_v3 }
  0x53   :  { %v312_v54 = vadd.f32 %v1905_v44, %v299_v6  ;;  %v584_v0 = vmax.f32 %v575_v53, %v581_v27  ;;  %v601_v49 = vrot.slane %v597_v51, 1  ;;  %v568_v55 = vsel %vm148_vm0, %v566_v40, %v567_v48 }
  0x54   :  { %v589_v63 = vrot.slane %v585_v59, 1  ;;  %v602_v24 = vrot.slane %v598_v60, 1  ;;  %v551_v33 = vadd.f32 %v549_v36, %v529_v19  ;;  %v552_v45 = vadd.f32 %v550_v26, %v530_v35 }
  0x55   :  { %v572_v32 = vmax.f32 %v563_v37, %v567_v48  ;;  %v588_v61 = vrot.slane %v584_v0, 1  ;;  %v571_v41 = vmax.f32 %v562_v11, %v568_v55  ;;  %v620_v5 = vmax.f32 %v1457_v2, %v1469_v12 }
  0x56   :  { %v603_v10 = vsel %vm148_vm0, %v601_v49, %v602_v24  ;;  %v607_v34 = vmax.f32 %v598_v60, %v602_v24  ;;  %v337_v8 = vmax.f32 %v1473_v18, %v332_v42  ;;  %v1612_v6 = vadd.s32 8, %v1448_v56  ;;  %v1907_v60 = vld [vmem:[#allocation9_spill] sm:$0xff] }
  0x57   :  { %v606_v53 = vmax.f32 %v597_v51, %v603_v10  ;;  %v326_v17 = vadd.f32 %v1530_v50, %v313_v43  ;;  %v336_v9 = vmax.f32 %v1471_v16, %v1568_v25  ;;  %v590_v52 = vsel %vm148_vm0, %v588_v61, %v589_v63  ;;  %v1908_v61 = vld [vmem:[#allocation12_spill] sm:$0xff] }
  0x58   :  { %v623_v35 = vrot.slane %v619_v46, 1  ;;  %v1906_v21 = vmax.f32 %v1459_v3, %v1527_v47  ;;  %v611_v62 = vrot.slane %v607_v34, 1  ;;  %v624_v26 = vrot.slane %v620_v5, 1 }
  0x59   :  { %v610_v29 = vrot.slane %v606_v53, 1  ;;  %v573_v42 = vadd.f32 %v571_v41, %v551_v33  ;;  %v574_v11 = vadd.f32 %v572_v32, %v552_v45  ;;  %v594_v30 = vmax.f32 %v585_v59, %v589_v63 }
  0x5a   :  { %v325_v37 = vadd.f32 %v1906_v21, %v312_v54  ;;  %v642_v19 = vmax.f32 %v1469_v12, %v1473_v18  ;;  %v593_v50 = vmax.f32 %v584_v0, %v590_v52  ;;  %v625_v36 = vsel %vm148_vm0, %v623_v35, %v624_v26  ;;  %v1910_v21 = vld [vmem:[#allocation16_spill] sm:$0xff] }
  0x5b   :  { %v641_v25 = vmax.f32 %v1459_v3, %v1471_v16  ;;  %v1628_v48 = vmax.f32 %v1360_v4, %v1372_v22  ;;  %v629_v47 = vmax.f32 %v620_v5, %v624_v26  ;;  %v612_v27 = vsel %vm148_vm0, %v610_v29, %v611_v62 }
  0x5c   :  { %v1633_v59 = vmax.f32 %v619_v46, %v625_v36  ;;  %v1637_v44 = vmax.f32 %v1907_v60, %v1374_v23  ;;  %v1640_v43 = vadd.f32 %v336_v9, %v325_v37  ;;  %v339_v4 = vadd.f32 %v337_v8, %v326_v17  ;;  %v1909_v17 = vld [vmem:[#allocation15_spill] sm:$0xff] }
  0x5d   :  { %v683_v54 = vrot.slane %v1628_v48, 1  ;;  %v596_v0 = vadd.f32 %v594_v30, %v574_v11  ;;  %v646_v49 = vrot.slane %v642_v19, 1  ;;  %v595_v55 = vadd.f32 %v593_v50, %v573_v42 }
  0x5e   :  { %v645_v63 = vrot.slane %v641_v25, 1  ;;  %v684_v24 = vrot.slane %v1637_v44, 1  ;;  %v1645_v33 = vmax.f32 %v1372_v22, %v1380_v28  ;;  %v615_v46 = vmax.f32 %v606_v53, %v612_v27 }
  0x5f   :  { %v616_v45 = vmax.f32 %v607_v34, %v611_v62  ;;  %v633_v32 = vrot.slane %v629_v47, 1  ;;  %v1649_v41 = vmax.f32 %v1374_v23, %v1908_v61  ;;  %v632_v10 = vrot.slane %v1633_v59, 1 }
  0x60   :  { %v685_v5 = vsel %vm148_vm0, %v683_v54, %v684_v24  ;;  %v705_v8 = vrot.slane %v1645_v33, 1  ;;  %v1656_v9 = vmax.f32 %v1380_v28, %v1909_v17  ;;  %v1658_v52 = vmax.f32 %v642_v19, %v646_v49 }
  0x61   :  { %v688_v22 = vmax.f32 %v1628_v48, %v685_v5  ;;  %v689_v34 = vmax.f32 %v1637_v44, %v684_v24  ;;  %v706_v53 = vrot.slane %v1649_v41, 1  ;;  %v1664_v23 = vsel %vm148_vm0, %v339_v4, 0.0 }
  0x62   :  { %v647_v35 = vsel %vm148_vm0, %v645_v63, %v646_v49  ;;  %v1669_v37 = vmax.f32 %v1908_v61, %v1910_v21  ;;  %v727_v29 = vrot.slane %v1656_v9, 1  ;;  %v1672_v62 = vadd.f32 %v615_v46, %v595_v55 }
  0x63   :  { %v618_v26 = vadd.f32 %v616_v45, %v596_v0  ;;  %v692_v42 = vrot.slane %v688_v22, 2  ;;  %v693_v11 = vrot.slane %v689_v34, 2  ;;  %v638_v30 = vmax.f32 %v629_v47, %v633_v32 }
  0x64   :  { %v707_v19 = vsel %vm148_vm0, %v705_v8, %v706_v53  ;;  %v711_v50 = vmax.f32 %v1649_v41, %v706_v53  ;;  %v728_v36 = vrot.slane %v1669_v37, 1  ;;  %v634_v27 = vsel %vm148_vm0, %v632_v10, %v633_v32 }
  0x65   :  { %v1678_v60 = vmax.f32 %v641_v25, %v647_v35  ;;  %v655_v54 = vrot.slane %v1658_v52, 1  ;;  %v1683_v4 = vmax.f32 %v1909_v17, %v1423_v14  ;;  %v694_v0 = vsel %vm663_vm1, %v692_v42, %v693_v11 }
  0x66   :  { %v710_v47 = vmax.f32 %v1645_v33, %v707_v19  ;;  %v715_v49 = vrot.slane %v711_v50, 2  ;;  %v729_v55 = vsel %vm148_vm0, %v727_v29, %v728_v36  ;;  %v698_v63 = vmax.f32 %v689_v34, %v693_v11 }
  0x67   :  { %v732_v24 = vmax.f32 %v1656_v9, %v729_v55  ;;  %v733_v46 = vmax.f32 %v1669_v37, %v728_v36  ;;  %v1692_v25 = vmax.f32 %v1910_v21, %v1425_v15  ;;  %v749_v10 = vrot.slane %v1683_v4, 1 }
  0x68   :  { %v714_v45 = vrot.slane %v710_v47, 2  ;;  %v720_v32 = vmax.f32 %v711_v50, %v715_v49  ;;  %v1697_v5 = vmax.f32 %v1423_v14, %v1435_v38  ;;  %v697_v8 = vmax.f32 %v688_v22, %v694_v0 }
  0x69   :  { %v736_v17 = vrot.slane %v732_v24, 2  ;;  %v737_v53 = vrot.slane %v733_v46, 2  ;;  %v750_v34 = vrot.slane %v1692_v25, 1  ;;  %v637_v35 = vmax.f32 %v1633_v59, %v634_v27 }
  0x6a   :  { %v716_v29 = vsel %vm663_vm1, %v714_v45, %v715_v49  ;;  %v1704_v21 = vmax.f32 %v1425_v15, %v1437_v39  ;;  %v771_v42 = vrot.slane %v1697_v5, 1  ;;  %v722_v19 = vadd.f32 %v720_v32, %v698_v63 }
  0x6b   :  { %v719_v11 = vmax.f32 %v710_v47, %v716_v29  ;;  %v738_v14 = vsel %vm663_vm1, %v736_v17, %v737_v53  ;;  %v742_v50 = vmax.f32 %v733_v46, %v737_v53  ;;  %v640_v22 = vadd.f32 %v638_v30, %v618_v26 }
  0x6c   :  { %v751_v36 = vsel %vm148_vm0, %v749_v10, %v750_v34  ;;  %v755_v0 = vmax.f32 %v1692_v25, %v750_v34  ;;  %v772_v59 = vrot.slane %v1704_v21, 1  ;;  %v654_v27 = vrot.slane %v1678_v60, 1 }
  0x6d   :  { %v721_v49 = vadd.f32 %v719_v11, %v697_v8  ;;  %v741_v55 = vmax.f32 %v732_v24, %v738_v14  ;;  %v754_v15 = vmax.f32 %v1683_v4, %v751_v36  ;;  %v1717_v26 = vmax.f32 %v1435_v38, %v1455_v1 }
  0x6e   :  { %v759_v45 = vrot.slane %v755_v0, 2  ;;  %v773_v47 = vsel %vm148_vm0, %v771_v42, %v772_v59  ;;  %v777_v63 = vmax.f32 %v1704_v21, %v772_v59  ;;  %v660_v30 = vmax.f32 %v1658_v52, %v655_v54 }
  0x6f   :  { %v744_v46 = vadd.f32 %v742_v50, %v722_v19  ;;  %v758_v32 = vrot.slane %v754_v15, 2  ;;  %v776_v10 = vmax.f32 %v1697_v5, %v773_v47  ;;  %v1723_v24 = vmax.f32 %v1437_v39, %v1457_v2 }
  0x70   :  { %v764_v17 = vmax.f32 %v755_v0, %v759_v45  ;;  %v781_v8 = vrot.slane %v777_v63, 2  ;;  %v793_v53 = vrot.slane %v1717_v26, 1  ;;  %v656_v34 = vsel %vm148_vm0, %v654_v27, %v655_v54 }
  0x71   :  { %v760_v29 = vsel %vm663_vm1, %v758_v32, %v759_v45  ;;  %v780_v42 = vrot.slane %v776_v10, 2  ;;  %v811_v52 = vmax.f32 %v1455_v1, %v1471_v16  ;;  %v341_v11 = vadd.f32 %v1664_v23, %v1640_v43  ;;  %v1912_v32 = vld [vmem:[#allocation11_spill] sm:$0xff] }
  0x72   :  { %v743_v19 = vadd.f32 %v741_v55, %v721_v49  ;;  %v763_v14 = vmax.f32 %v754_v15, %v760_v29  ;;  %v794_v50 = vrot.slane %v1723_v24, 1  ;;  %v639_v36 = vadd.f32 %v637_v35, %v1672_v62  ;;  %v1911_v35 = vld [vmem:[#allocation10_spill] sm:$0xff] }
  0x73   :  { %v782_v0 = vsel %vm663_vm1, %v780_v42, %v781_v8  ;;  %v812_v54 = vmax.f32 %v1457_v2, %v1473_v18  ;;  %v815_v59 = vrot.slane %v811_v52, 1  ;;  %v659_v27 = vmax.f32 %v1678_v60, %v656_v34  ;;  %v1914_v42 = vld [vmem:[#allocation14_spill] sm:$0xff] }
  0x74   :  { %v662_v45 = vadd.f32 %v660_v30, %v640_v22  ;;  %v766_v47 = vadd.f32 %v764_v17, %v744_v46  ;;  %v795_v1 = vsel %vm148_vm0, %v793_v53, %v794_v50  ;;  %v786_v16 = vmax.f32 %v777_v63, %v781_v8  ;;  %v1913_v30 = vld [vmem:[#allocation13_spill] sm:$0xff] }
  0x75   :  { %v798_v43 = vmax.f32 %v1717_v26, %v795_v1  ;;  %v799_v23 = vmax.f32 %v1723_v24, %v794_v50  ;;  %v816_v49 = vrot.slane %v812_v54, 1  ;;  %v765_v55 = vadd.f32 %v763_v14, %v743_v19 }
  0x76   :  { %v785_v62 = vmax.f32 %v776_v10, %v782_v0  ;;  %v880_v15 = vmax.f32 %v1628_v48, %v1911_v35  ;;  %v881_v2 = vmax.f32 %v1637_v44, %v1912_v32  ;;  %v911_v63 = vmax.f32 %v1645_v33, %v1913_v30 }
  0x77   :  { %v802_v18 = vrot.slane %v798_v43, 2  ;;  %v803_v60 = vrot.slane %v799_v23, 2  ;;  %v817_v22 = vsel %vm148_vm0, %v815_v59, %v816_v49  ;;  %v821_v17 = vmax.f32 %v812_v54, %v816_v49 }
  0x78   :  { %v820_v46 = vmax.f32 %v811_v52, %v817_v22  ;;  %v884_v8 = vrot.slane %v880_v15, 1  ;;  %v885_v53 = vrot.slane %v881_v2, 1  ;;  %v788_v34 = vadd.f32 %v786_v16, %v766_v47 }
  0x79   :  { %v804_v10 = vsel %vm663_vm1, %v802_v18, %v803_v60  ;;  %v808_v29 = vmax.f32 %v799_v23, %v803_v60  ;;  %v912_v19 = vmax.f32 %v1649_v41, %v1914_v42  ;;  %v342_v14 = vrot.slane %v341_v11, 4 }
  0x7a   :  { %v824_v50 = vrot.slane %v820_v46, 2  ;;  %v825_v0 = vrot.slane %v821_v17, 2  ;;  %v886_v1 = vsel %vm148_vm0, %v884_v8, %v885_v53  ;;  %v661_v59 = vadd.f32 %v659_v27, %v639_v36 }
  0x7b   :  { %v889_v40 = vmax.f32 %v880_v15, %v886_v1  ;;  %v890_v51 = vmax.f32 %v881_v2, %v885_v53  ;;  %v915_v33 = vrot.slane %v911_v63, 1  ;;  %v664_v52 = vsel %vm663_vm1, %v662_v45, 0.0 }
  0x7c   :  { %v787_v54 = vadd.f32 %v785_v62, %v765_v55  ;;  %v807_v49 = vmax.f32 %v798_v43, %v804_v10  ;;  %v916_v47 = vrot.slane %v912_v19, 1  ;;  %v810_v16 = vadd.f32 %v808_v29, %v788_v34 }
  0x7d   :  { %v893_v18 = vrot.slane %v889_v40, 2  ;;  %v894_v23 = vrot.slane %v890_v51, 2  ;;  %v942_v41 = vmax.f32 %v1656_v9, %v1417_v7  ;;  %v826_v60 = vsel %vm663_vm1, %v824_v50, %v825_v0 }
  0x7e   :  { %v917_v22 = vsel %vm148_vm0, %v915_v33, %v916_v47  ;;  %v921_v8 = vmax.f32 %v912_v19, %v916_v47  ;;  %v943_v36 = vmax.f32 %v1669_v37, %v1421_v13  ;;  %v830_v27 = vmax.f32 %v821_v17, %v825_v0 }
  0x7f   :  { %v895_v45 = vsel %vm663_vm1, %v893_v18, %v894_v23  ;;  %v899_v55 = vmax.f32 %v890_v51, %v894_v23  ;;  %v920_v43 = vmax.f32 %v911_v63, %v917_v22  ;;  %v1760_v62 = vadd.f32 %v342_v14, %v341_v11 }
  0x80   :  { %v665_v15 = vadd.f32 %v664_v52, %v661_v59  ;;  %v898_v2 = vmax.f32 %v889_v40, %v895_v45  ;;  %v925_v53 = vrot.slane %v921_v8, 2  ;;  %v809_v9 = vadd.f32 %v807_v49, %v787_v54 }
  0x81   :  { %v829_v34 = vmax.f32 %v820_v46, %v826_v60  ;;  %v924_v10 = vrot.slane %v920_v43, 2  ;;  %v946_v29 = vrot.slane %v942_v41, 1  ;;  %v903_v19 = vrot.slane %v899_v55, 1 }
  0x82   :  { %v902_v50 = vrot.slane %v898_v2, 1  ;;  %v930_v1 = vmax.f32 %v921_v8, %v925_v53  ;;  %v947_v33 = vrot.slane %v943_v36, 1  ;;  %v832_v37 = vadd.f32 %v830_v27, %v810_v16 }
  0x83   :  { %v926_v17 = vsel %vm663_vm1, %v924_v10, %v925_v53  ;;  %v973_v51 = vmax.f32 %v1683_v4, %v1427_v20  ;;  %v974_v11 = vmax.f32 %v1692_v25, %v1431_v31  ;;  %v1915_v40 = vand.u32 1, %v1448_v56 }
  0x84   :  { %v1918_v46 = vand.u32 1, %v1612_v6  ;;  %v929_v0 = vmax.f32 %v920_v43, %v926_v17  ;;  %v934_v59 = vrot.slane %v930_v1, 1  ;;  %v344_v52 = vrot.slane %v1760_v62, 2 }
  0x85   :  { %vm1769_vm3 = vcmp.eq.s32.totalorder %v1915_v40, 0  ;;  %v948_v54 = vsel %vm148_vm0, %v946_v29, %v947_v33  ;;  %v952_v49 = vmax.f32 %v943_v36, %v947_v33  ;;  %v977_v47 = vrot.slane %v973_v51, 1 }
  0x86   :  { %vm1775_vm4 = vcmp.eq.s32.totalorder %v1918_v46, 0  ;;  %v666_v16 = vrot.slane %v665_v15, 4  ;;  %v904_v18 = vsel %vm148_vm0, %v902_v50, %v903_v19  ;;  %v933_v23 = vrot.slane %v929_v0, 1 }
  0x87   :  { %v951_v60 = vmax.f32 %v942_v41, %v948_v54  ;;  %v831_v22 = vadd.f32 %v829_v34, %v809_v9  ;;  %v863_v8 = vsel %vm1775_vm4, %v832_v37, 0.0  ;;  %v956_v27 = vrot.slane %v952_v49, 2 }
  0x88   :  { %v978_v45 = vrot.slane %v974_v11, 1  ;;  %v908_v53 = vmax.f32 %v899_v55, %v903_v19  ;;  %v935_v43 = vsel %vm148_vm0, %v933_v23, %v934_v59  ;;  %v939_v10 = vmax.f32 %v930_v1, %v934_v59 }
  0x89   :  { %v955_v17 = vrot.slane %v951_v60, 2  ;;  %v907_v40 = vmax.f32 %v898_v2, %v904_v18  ;;  %v961_v29 = vmax.f32 %v952_v49, %v956_v27  ;;  %v1004_v50 = vmax.f32 %v1697_v5, %v1450_v57 }
  0x8a   :  { %v979_v36 = vsel %vm148_vm0, %v977_v47, %v978_v45  ;;  %v938_v33 = vmax.f32 %v929_v0, %v935_v43  ;;  %v983_v34 = vmax.f32 %v974_v11, %v978_v45  ;;  %v862_v37 = vsel %vm1769_vm3, %v831_v22, 0.0 }
  0x8b   :  { %v957_v41 = vsel %vm663_vm1, %v955_v17, %v956_v27  ;;  %v982_v9 = vmax.f32 %v973_v51, %v979_v36  ;;  %v865_v55 = vsel %vm864_vm2, %v863_v8, 0.0  ;;  %v965_v1 = vrot.slane %v961_v29, 1 }
  0x8c   :  { %v960_v19 = vmax.f32 %v951_v60, %v957_v41  ;;  %v941_v46 = vadd.f32 %v939_v10, %v908_v53  ;;  %v987_v59 = vrot.slane %v983_v34, 2  ;;  %v1005_v54 = vmax.f32 %v1704_v21, %v1452_v58 }
  0x8d   :  { %v986_v2 = vrot.slane %v982_v9, 2  ;;  %v1794_v49 = vadd.f32 %v666_v16, %v665_v15  ;;  %v970_v0 = vmax.f32 %v961_v29, %v965_v1  ;;  %v1008_v47 = vrot.slane %v1004_v50, 1 }
  0x8e   :  { %v964_v5 = vrot.slane %v960_v19, 1  ;;  %v940_v51 = vadd.f32 %v938_v33, %v907_v40  ;;  %v992_v18 = vmax.f32 %v983_v34, %v987_v59  ;;  %v1009_v23 = vrot.slane %v1005_v54, 1 }
  0x8f   :  { %v988_v11 = vsel %vm663_vm1, %v986_v2, %v987_v59  ;;  %v1797_v22 = vadd.f32 %v865_v55, %v862_v37  ;;  %v1035_v27 = vmax.f32 %v1717_v26, %v1459_v3  ;;  %v972_v21 = vadd.f32 %v970_v0, %v941_v46 }
  0x90   :  { %v966_v60 = vsel %vm148_vm0, %v964_v5, %v965_v1  ;;  %v991_v8 = vmax.f32 %v982_v9, %v988_v11  ;;  %v996_v15 = vrot.slane %v992_v18, 1  ;;  %v1010_v16 = vsel %vm148_vm0, %v1008_v47, %v1009_v23 }
  0x91   :  { %v969_v45 = vmax.f32 %v960_v19, %v966_v60  ;;  %v1013_v43 = vmax.f32 %v1004_v50, %v1010_v16  ;;  %v1014_v10 = vmax.f32 %v1005_v54, %v1009_v23  ;;  %v1036_v17 = vmax.f32 %v1723_v24, %v1469_v12 }
  0x92   :  { %v995_v53 = vrot.slane %v991_v8, 1  ;;  %v1806_v40 = vadd.f32 %v344_v52, %v1760_v62  ;;  %v1001_v36 = vmax.f32 %v992_v18, %v996_v15  ;;  %v1039_v33 = vrot.slane %v1035_v27, 1 }
  0x93   :  { %v971_v29 = vadd.f32 %v969_v45, %v940_v51  ;;  %v1017_v26 = vrot.slane %v1013_v43, 2  ;;  %v1018_v9 = vrot.slane %v1014_v10, 2  ;;  %v1040_v34 = vrot.slane %v1036_v17, 1 }
  0x94   :  { %v997_v41 = vsel %vm148_vm0, %v995_v53, %v996_v15  ;;  %v668_v37 = vrot.slane %v1794_v49, 2  ;;  %v867_v55 = vrot.slane %v1797_v22, 4  ;;  %v1003_v19 = vadd.f32 %v1001_v36, %v972_v21 }
  0x95   :  { %v1000_v50 = vmax.f32 %v991_v8, %v997_v41  ;;  %v1019_v1 = vsel %vm663_vm1, %v1017_v26, %v1018_v9  ;;  %v1023_v24 = vmax.f32 %v1014_v10, %v1018_v9  ;;  %v1041_v62 = vsel %vm148_vm0, %v1039_v33, %v1040_v34 }
  0x96   :  { %v1045_v52 = vmax.f32 %v1036_v17, %v1040_v34  ;;  %v1022_v2 = vmax.f32 %v1013_v43, %v1019_v1  ;;  %v1044_v59 = vmax.f32 %v1035_v27, %v1041_v62  ;;  %v1084_v54 = vmax.f32 %v1628_v48, %v1380_v28 }
  0x97   :  { %v1002_v46 = vadd.f32 %v1000_v50, %v971_v29  ;;  %v1027_v5 = vrot.slane %v1023_v24, 1  ;;  %v1085_v47 = vmax.f32 %v1637_v44, %v1908_v61  ;;  %v1115_v51 = vmax.f32 %v1911_v35, %v1913_v30 }
  0x98   :  { %v1049_v0 = vrot.slane %v1045_v52, 2  ;;  %v1026_v11 = vrot.slane %v1022_v2, 1  ;;  %v1048_v18 = vrot.slane %v1044_v59, 2  ;;  %v1088_v23 = vrot.slane %v1084_v54, 1 }
  0x99   :  { %v1116_v60 = vmax.f32 %v1912_v32, %v1914_v42  ;;  %v1032_v8 = vmax.f32 %v1023_v24, %v1027_v5  ;;  %v1089_v45 = vrot.slane %v1085_v47, 1  ;;  %v1117_v28 = vmax.f32 %v1115_v51, %v1417_v7 }
  0x9a   :  { %v1054_v27 = vmax.f32 %v1045_v52, %v1049_v0  ;;  %v1028_v48 = vsel %vm148_vm0, %v1026_v11, %v1027_v5  ;;  %v1050_v21 = vsel %vm663_vm1, %v1048_v18, %v1049_v0  ;;  %v1148_v61 = vmax.f32 %v1683_v4, %v1435_v38 }
  0x9b   :  { %v1118_v44 = vmax.f32 %v1116_v60, %v1421_v13  ;;  %v1031_v35 = vmax.f32 %v1022_v2, %v1028_v48  ;;  %v1034_v30 = vadd.f32 %v1032_v8, %v1003_v19  ;;  %v1053_v15 = vmax.f32 %v1044_v59, %v1050_v21 }
  0x9c   :  { %v1058_v16 = vrot.slane %v1054_v27, 1  ;;  %v1090_v32 = vsel %vm148_vm0, %v1088_v23, %v1089_v45  ;;  %v1094_v42 = vmax.f32 %v1085_v47, %v1089_v45  ;;  %v1121_v53 = vrot.slane %v1117_v28, 1 }
  0x9d   :  { %v1122_v43 = vrot.slane %v1118_v44, 1  ;;  %v1033_v10 = vadd.f32 %v1031_v35, %v1002_v46  ;;  %v1057_v7 = vrot.slane %v1053_v15, 1  ;;  %v1093_v29 = vmax.f32 %v1084_v54, %v1090_v32 }
  0x9e   :  { %v1063_v17 = vmax.f32 %v1054_v27, %v1058_v16  ;;  %v1098_v36 = vrot.slane %v1094_v42, 2  ;;  %v1149_v38 = vmax.f32 %v1692_v25, %v1437_v39  ;;  %v868_v34 = vadd.f32 %v867_v55, %v1797_v22 }
  0x9f   :  { %v1123_v33 = vsel %vm148_vm0, %v1121_v53, %v1122_v43  ;;  %v1127_v13 = vmax.f32 %v1118_v44, %v1122_v43  ;;  %v1059_v4 = vsel %vm148_vm0, %v1057_v7, %v1058_v16  ;;  %v1097_v26 = vrot.slane %v1093_v29, 2 }
  0xa0   :  { %v1065_v41 = vadd.f32 %v1063_v17, %v1034_v30  ;;  %v1126_v9 = vmax.f32 %v1117_v28, %v1123_v33  ;;  %v1062_v50 = vmax.f32 %v1053_v15, %v1059_v4  ;;  %v1152_v1 = vrot.slane %v1148_v61, 1 }
  0xa1   :  { %v1131_v19 = vrot.slane %v1127_v13, 2  ;;  %v1099_v62 = vsel %vm663_vm1, %v1097_v26, %v1098_v36  ;;  %v1153_v46 = vrot.slane %v1149_v38, 1  ;;  %v1103_v59 = vmax.f32 %v1094_v42, %v1098_v36 }
  0xa2   :  { %v1067_v24 = vsel %vm1775_vm4, %v1065_v41, 0.0  ;;  %v1130_v52 = vrot.slane %v1126_v9, 2  ;;  %v1064_v2 = vadd.f32 %v1062_v50, %v1033_v10  ;;  %v1837_v25 = vmax.f32 %v1093_v29, %v1099_v62 }
  0xa3   :  { %v1069_v39 = vsel %vm1068_vm5, %v1067_v24, 0.0  ;;  %v1136_v5 = vmax.f32 %v1127_v13, %v1131_v19  ;;  %v1154_v22 = vsel %vm148_vm0, %v1152_v1, %v1153_v46  ;;  %v346_v55 = vrot.slane %v1806_v40, 1 }
  0xa4   :  { %v1132_v54 = vsel %vm663_vm1, %v1130_v52, %v1131_v19  ;;  %v1066_v14 = vsel %vm1769_vm3, %v1064_v2, 0.0  ;;  %v669_v47 = vadd.f32 %v668_v37, %v1794_v49  ;;  %v869_v51 = vrot.slane %v868_v34, 2 }
  0xa5   :  { %v1135_v0 = vmax.f32 %v1126_v9, %v1132_v54  ;;  %v1070_v11 = vadd.f32 %v1069_v39, %v1066_v14  ;;  %v1157_v18 = vmax.f32 %v1148_v61, %v1154_v22  ;;  %v1106_v23 = vrot.slane %v1837_v25, 2 }
  0xa6   :  { %v1107_v60 = vrot.slane %v1103_v59, 2  ;;  %v1158_v8 = vmax.f32 %v1149_v38, %v1153_v46  ;;  %v1140_v28 = vrot.slane %v1136_v5, 2  ;;  %v347_v21 = vadd.f32 %v346_v55, %v1806_v40 }
  0xa7   :  { %v1071_v27 = vrot.slane %v1070_v11, 4  ;;  %v1139_v45 = vrot.slane %v1135_v0, 2  ;;  %v1161_v48 = vrot.slane %v1157_v18, 2  ;;  %v1179_v44 = vmax.f32 %v1427_v20, %v1450_v57 }
  0xa8   :  { %v1162_v63 = vrot.slane %v1158_v8, 2  ;;  %v670_v35 = vrot.slane %v669_v47, 1  ;;  %v870_v30 = vadd.f32 %v869_v51, %v868_v34  ;;  %v1180_v37 = vmax.f32 %v1431_v31, %v1452_v58 }
  0xa9   :  { %v1072_v49 = vadd.f32 %v1071_v27, %v1070_v11  ;;  %v1112_v61 = vmax.f32 %v1103_v59, %v1107_v60  ;;  %v1181_v32 = vmax.f32 %v1179_v44, %v1459_v3  ;;  %v1108_v42 = vsel %vm663_vm1, %v1106_v23, %v1107_v60 }
  0xaa   :  { %v1163_v15 = vsel %vm663_vm1, %v1161_v48, %v1162_v63  ;;  %v1167_v16 = vmax.f32 %v1158_v8, %v1162_v63  ;;  %v1141_v40 = vsel %vm663_vm1, %v1139_v45, %v1140_v28  ;;  %v1182_v43 = vmax.f32 %v1180_v37, %v1469_v12 }
  0xab   :  { %v1166_v53 = vmax.f32 %v1157_v18, %v1163_v15  ;;  %v1185_v57 = vrot.slane %v1181_v32, 1  ;;  %v1859_v10 = vmul.u32.u64.low 2863311531, %v1448_v56  ;;  %v1860_v7 = vmul.u32.u64.high 2863311531, %v1448_v56, %v1859_v10 }
  0xac   :  { %v1171_v20 = vrot.slane %v1167_v16, 2  ;;  %v1073_v31 = vrot.slane %v1072_v49, 2  ;;  %v1145_v58 = vmax.f32 %v1136_v5, %v1140_v28  ;;  %v1186_v29 = vrot.slane %v1182_v43, 1 }
  0xad   :  { %v1170_v17 = vrot.slane %v1166_v53, 2  ;;  %v348_v36 = vmax.f32 %v347_v21, 0.0  ;;  %v671_v33 = vadd.f32 %v670_v35, %v669_v47  ;;  %v1111_v38 = vmax.f32 %v1837_v25, %v1108_v42 }
  0xae   :  { %v1863_v3 = vmul.u32.u64.low 2863311531, %v1612_v6  ;;  %v1864_v13 = vmul.u32.u64.high 2863311531, %v1612_v6, %v1863_v3  ;;  %v1144_v4 = vmax.f32 %v1135_v0, %v1141_v40  ;;  %v1187_v12 = vsel %vm148_vm0, %v1185_v57, %v1186_v29 }
  0xaf   :  { %v1191_v41 = vmax.f32 %v1182_v43, %v1186_v29  ;;  %v871_v26 = vrot.slane %v870_v30, 1  ;;  %v1172_v9 = vsel %vm663_vm1, %v1170_v17, %v1171_v20  ;;  %v1190_v34 = vmax.f32 %v1181_v32, %v1187_v12 }
  0xb0   :  { %v1218_v50 = vshrl.u32 %v1860_v7, 1  ;;  %v1074_v19 = vadd.f32 %v1073_v31, %v1072_v49  ;;  %v1147_v1 = vadd.f32 %v1145_v58, %v1112_v61  ;;  %v1176_v24 = vmax.f32 %v1167_v16, %v1171_v20 }
  0xb1   :  { %v1195_v62 = vrot.slane %v1191_v41, 2  ;;  %v349_v52 = vadd.f32 1.0, %v348_v36  ;;  %v1194_v46 = vrot.slane %v1190_v34, 2  ;;  %v1229_v39 = vshrl.u32 %v1864_v13, 1 }
  0xb2   :  { %v1219_v2 = vmul.u32 3, %v1218_v50  ;;  %v672_v25 = vmax.f32 %v671_v33, 0.0  ;;  %v1146_v59 = vadd.f32 %v1144_v4, %v1111_v38  ;;  %v1175_v54 = vmax.f32 %v1166_v53, %v1172_v9 }
  0xb3   :  { %v1200_v5 = vmax.f32 %v1191_v41, %v1195_v62  ;;  %v872_v22 = vadd.f32 %v871_v26, %v870_v30  ;;  %v1196_v55 = vsel %vm663_vm1, %v1194_v46, %v1195_v62  ;;  %v1230_v0 = vmul.u32 3, %v1229_v39 }
  0xb4   :  { %v1220_v14 = vsub.s32 %v1448_v56, %v1219_v2  ;;  %v1075_v47 = vrot.slane %v1074_v19, 1  ;;  %v1178_v51 = vadd.f32 %v1176_v24, %v1147_v1  ;;  %v1199_v11 = vmax.f32 %v1190_v34, %v1196_v55 }
  0xb5   :  { %v1204_v18 = vrot.slane %v1200_v5, 2  ;;  %v1231_v23 = vsub.s32 %v1612_v6, %v1230_v0  ;;  %v673_v8 = vadd.f32 1.0, %v672_v25  ;;  %v1177_v27 = vadd.f32 %v1175_v54, %v1146_v59 }
  0xb6   :  { %vm1234_vm6 = vcmp.ne.s32.totalorder %v1220_v14, 0  ;;  %vm1236_vm7 = vcmp.lt.s32.totalorder %v1220_v14, 0  ;;  %v1240_v60 = vadd.s32 3, %v1220_v14  ;;  %v1203_v45 = vrot.slane %v1199_v11, 2 }
  0xb7   :  { %v1209_v28 = vmax.f32 %v1200_v5, %v1204_v18  ;;  %vm1238_vm8 = vmand %vm1236_vm7, %vm1234_vm6  ;;  %vm1235_vm9 = vcmp.ne.s32.totalorder %v1231_v23, 0  ;;  %vm1237_vm10 = vcmp.lt.s32.totalorder %v1231_v23, 0  ;;  %v1241_v48 = vadd.s32 3, %v1231_v23 }
  0xb8   :  { %v1242_v21 = vsel %vm1238_vm8, %v1240_v60, %v1220_v14  ;;  %v873_v56 = vmax.f32 %v872_v22, 0.0  ;;  %v1076_v63 = vadd.f32 %v1075_v47, %v1074_v19  ;;  %v1205_v44 = vsel %vm663_vm1, %v1203_v45, %v1204_v18  ;;  %vm1239_vm11 = vmand %vm1237_vm10, %vm1235_vm9 }
  0xb9   :  { %v1211_v35 = vadd.f32 %v1209_v28, %v1178_v51  ;;  %v1208_v30 = vmax.f32 %v1199_v11, %v1205_v44  ;;  %v1243_v6 = vsel %vm1239_vm11, %v1241_v48, %v1231_v23  ;;  %vm1244_vm13 = vcmp.eq.s32.totalorder %v1242_v21, 0 }
  0xba   :  { %vm1245_vm14 = vcmp.eq.s32.totalorder %v1243_v6, 0  ;;  %1289 = vlog2.f32 %v349_v52  ;;  %v874_v61 = vadd.f32 1.0, %v873_v56  ;;  %v1077_v15 = vmax.f32 %v1076_v63, 0.0 }
  0xbb   :  { %v1210_v49 = vadd.f32 %v1208_v30, %v1177_v27  ;;  %v1247_v37 = vsel %vm1245_vm14, %v1211_v35, 0.0  ;;  %1291 = vlog2.f32 %v673_v8 }
  0xbc   :  { %v1249_v16 = vsel %vm1248_vm12, %v1247_v37, 0.0  ;;  %1293 = vlog2.f32 %v874_v61  ;;  %v1078_v40 = vadd.f32 1.0, %v1077_v15 }
  0xbd   :  { %v1246_v32 = vsel %vm1244_vm13, %v1210_v49, 0.0 }
  0xbe   :  { %v1250_v42 = vadd.f32 %v1249_v16, %v1246_v32  ;;  %1295 = vlog2.f32 %v1078_v40 }
  0xc0   :  { %v1251_v53 = vrot.slane %v1250_v42, 4 }
  0xc2   :  { %v1252_v43 = vadd.f32 %v1251_v53, %v1250_v42 }
  0xc4   :  { %v1253_v20 = vrot.slane %v1252_v43, 2 }
  0xc6   :  { %v1254_v57 = vadd.f32 %v1253_v20, %v1252_v43 }
  0xc7   :  { %v1290_v10 = vpop.eup %1289 }
  0xc8   :  { %v1255_v7 = vrot.slane %v1254_v57, 1  ;;  %v1292_v31 = vpop.eup %1291  ;;  %v351_v17 = vmul.f32 0.6931472, %v1290_v10 }
  0xc9   :  { %v675_v29 = vmul.f32 0.6931472, %v1292_v31  ;;  %v1294_v33 = vpop.eup %1293 }
  0xca   :  { %v1256_v58 = vadd.f32 %v1255_v7, %v1254_v57  ;;  %v353_v13 = vmul.f32 1.442695, %v351_v17  ;;  %v876_v4 = vmul.f32 0.6931472, %v1294_v33 }
  0xcb   :  { %v676_v38 = vmul.f32 1.442695, %v675_v29  ;;  %v1296_v12 = vpop.eup %1295 }
  0xcc   :  { %v1257_v36 = vmax.f32 %v1256_v58, 0.0  ;;  %v354_v41 = vmul.f32 0.8983706, %v353_v13  ;;  %v877_v9 = vmul.f32 1.442695, %v876_v4 }
  0xcd   :  { %v677_v26 = vmul.f32 0.3134081, %v676_v38  ;;  %v1080_v34 = vmul.f32 0.6931472, %v1296_v12 }
  0xce   :  { %v1258_v3 = vadd.f32 1.0, %v1257_v36  ;;  %v878_v19 = vmul.f32 -0.101629384, %v877_v9 }
  0xcf   :  { %v678_v50 = vadd.f32 %v677_v26, %v354_v41  ;;  %v1081_v1 = vmul.f32 1.442695, %v1080_v34 }
  0xd0   :  { %1297 = vlog2.f32 %v1258_v3 }
  0xd1   :  { %v879_v24 = vadd.f32 %v878_v19, %v678_v50  ;;  %v1082_v62 = vmul.f32 -0.4235575, %v1081_v1 }
  0xd3   :  { %v1083_v2 = vadd.f32 %v1082_v62, %v879_v24 }
  0xdd   :  { %v1298_v52 = vpop.eup %1297 }
  0xde   :  { %v1260_v46 = vmul.f32 0.6931472, %v1298_v52 }
  0xe0   :  { %v1261_v39 = vmul.f32 1.442695, %v1260_v46 }
  0xe2   :  { %v1262_v25 = vmul.f32 -0.68659186, %v1261_v39 }
  0xe4   :  { %v1263_v59 = vadd.f32 %v1262_v25, %v1083_v2 }
  0xe6   :  { %v1264_v54 = vmul.f32 0.6383934, %v1263_v59 }
  0xe8   :  { %1265 = vst [vmem:[#allocation6] sm:$0x1] %v1264_v54 }
  0xe9   :  { %1330 = shalt.err (!%p1327_p9)
}
  0xea   :  { %1275 = dma.vmem_to_hbm [thread:$0]  %s1273_s13, 16, %s1879_s1, [#allocation5]  }
  0xeb   :  { %1341 = dma.done.wait [#allocation5], 16  }
  0xec   :  { %1342 = vsyncadd [#allocation5], 4294967280 }
  0xed   :  { %1279 = vsyncpa [#allocation4], 1 }
  0xee   :  { %1280 = vsyncpa [#allocation5], 1 }

</bundles_post_ra>
